<compile_context>
chip_gen: v7x
topology: tpu7x:2x2x1
jax: 0.10.0
libtpu: 0.0.40
codegen_flags: <defaults>
</compile_context>

<pallas_src>
import functools

import jax
import jax.numpy as jnp
import numpy as np
from jax.experimental import pallas as pl
from jax.experimental.pallas import tpu as pltpu


def _leaky_relu(v, slope=0.01):
    # max(v, slope*v) == LeakyReLU(slope) for 0 < slope < 1 (single vmax).
    return jnp.maximum(v, slope * v)


def _feedforward_kernel(x_ref, w1_ref, b1_ref, w2_ref, b2_ref, o_ref, *, compute_dtype):
    """One row-block of the fused residual MLP.

    x_ref : (bm, F)   input rows (also the residual)
    w1_ref: (F, H)    first Linear weight, (in, out) layout
    b1_ref: (1, H)
    w2_ref: (H, F)    second Linear weight, (in, out) layout
    b2_ref: (1, F)
    o_ref : (bm, F)
    """
    x = x_ref[...]
    if x.dtype != compute_dtype:
        x = x.astype(compute_dtype)

    h = jnp.dot(x, w1_ref[...], preferred_element_type=jnp.float32) + b1_ref[...]
    h = _leaky_relu(h)
    if h.dtype != w2_ref.dtype:
        h = h.astype(w2_ref.dtype)

    y = jnp.dot(h, w2_ref[...], preferred_element_type=jnp.float32) + b2_ref[...]
    y = _leaky_relu(y)

    # Residual: re-read x from VMEM here instead of holding the value live
    # across both matmuls (keeps vreg pressure low at large bm).
    o_ref[...] = (y + x_ref[...]).astype(o_ref.dtype)


def _choose_block_rows(R, block_rows, max_bm_vmem):
    """Largest multiple-of-8 row block under the caps; prefer one that divides
    R exactly (no pad copy) and keep the grid >= 2 steps (v7x megacore)."""
    cap = min(block_rows, max_bm_vmem, R)
    if R >= 16:
        cap = min(cap, R // 2)          # at least 2 grid steps when possible
    cap = max(8, (cap // 8) * 8)
    for bm in range(cap, 7, -8):
        if R % bm == 0:
            return bm, False
    return cap, True                    # ragged fallback: pad


def feedforward_forward(x, params, *, block_rows=512, compute_dtype=jnp.float32):
    """x: (..., num_features). params: w1 (F,H), b1 (1,H), w2 (H,F), b2 (1,F)."""
    compute_dtype = jnp.dtype(compute_dtype)
    orig_shape = x.shape
    F = orig_shape[-1]
    H = params["w1"].shape[1]

    # Weights already live in (in, out) layout (stored that way at init), so no
    # per-call transpose traffic; cast once here if a bf16 MXU path is chosen.
    w1 = params["w1"]
    w2 = params["w2"]
    if w1.dtype != compute_dtype:
        w1 = w1.astype(compute_dtype)
    if w2.dtype != compute_dtype:
        w2 = w2.astype(compute_dtype)
    b1 = params["b1"].reshape(1, H)
    b2 = params["b2"].reshape(1, F)

    # Flatten leading dims into the row axis (sublane / MXU-row dimension);
    # the feature axis stays last -> lane-dense stores.
    x2 = x.reshape(-1, F)
    R = x2.shape[0]

    # --- explicit VMEM budget (v7x has only 64 MiB per TensorCore) ----------
    w_item = compute_dtype.itemsize
    x_item = x.dtype.itemsize
    # worst case: weights/biases double-buffered (fallback path)
    weight_bytes = 2 * ((F * H + H * F) * w_item + (H + F) * 4)
    io_bytes_per_row = 4 * F * x_item            # 2 input buffers + 2 output buffers
    budget = 40 * 1024 * 1024                    # headroom inside 64 MiB
    max_bm_vmem = max(8, ((budget - weight_bytes) // io_bytes_per_row) // 8 * 8)
    # TODO(synk): if weight_bytes alone exceeds the budget (very large F/H), the
    # weights would need K/N tiling instead of staying fully VMEM-resident.

    bm, needs_pad = _choose_block_rows(R, block_rows, max_bm_vmem)
    if needs_pad:
        R_pad = ((R + bm - 1) // bm) * bm
        x2 = jnp.pad(x2, ((0, R_pad - R), (0, 0)))   # rare ragged-tail fallback
    else:
        R_pad = R

    need_bytes = 4 * bm * F * x_item + weight_bytes
    vmem_limit = int(min(max(need_bytes * 5 // 4 + (2 << 20), 16 << 20), 64 << 20))

    def _bcast_spec(shape, single_buffer):
        zeros = (0,) * len(shape)
        if single_buffer:
            # Constant index_map: the block never changes -> one buffer suffices.
            return pl.BlockSpec(shape, lambda i: zeros, pipeline_mode=pl.Buffered(1))
        return pl.BlockSpec(shape, lambda i: zeros)

    def run(single_buffer_weights):
        return pl.pallas_call(
            functools.partial(_feedforward_kernel, compute_dtype=compute_dtype),
            out_shape=jax.ShapeDtypeStruct((R_pad, F), x.dtype),
            grid_spec=pltpu.PrefetchScalarGridSpec(
                num_scalar_prefetch=0,
                grid=(R_pad // bm,),
                in_specs=[
                    pl.BlockSpec((bm, F), lambda i: (i, 0)),      # x row block
                    _bcast_spec((F, H), single_buffer_weights),   # W1 (VMEM-resident)
                    _bcast_spec((1, H), single_buffer_weights),   # b1
                    _bcast_spec((H, F), single_buffer_weights),   # W2 (VMEM-resident)
                    _bcast_spec((1, F), single_buffer_weights),   # b2
                ],
                out_specs=pl.BlockSpec((bm, F), lambda i: (i, 0)),
            ),
            compiler_params=pltpu.CompilerParams(
                dimension_semantics=("parallel",),                # megacore on v7x
                vmem_limit_bytes=vmem_limit,
            ),
        )(x2, w1, b1, w2, b2)

    try:
        out = run(True)
    except Exception:
        # pl.Buffered(1) single-buffering not supported by this JAX/libtpu:
        # fall back to default double-buffered broadcast operands.
        out = run(False)

    if R_pad != R:
        out = out[:R]
    return out.reshape(orig_shape)


def _init_params(key, num_features, hidden_size):
    """PyTorch nn.Linear-style init, but weights stored in (in, out) layout so
    the forward never has to transpose them (perf feedback)."""
    k1, k2, k3, k4 = jax.random.split(key, 4)
    bnd1 = 1.0 / np.sqrt(num_features)   # fan_in of Linear(num_features, hidden)
    bnd2 = 1.0 / np.sqrt(hidden_size)    # fan_in of Linear(hidden, num_features)
    return {
        "w1": jax.random.uniform(k1, (num_features, hidden_size), jnp.float32, -bnd1, bnd1),
        "b1": jax.random.uniform(k2, (1, hidden_size), jnp.float32, -bnd1, bnd1),
        "w2": jax.random.uniform(k3, (hidden_size, num_features), jnp.float32, -bnd2, bnd2),
        "b2": jax.random.uniform(k4, (1, num_features), jnp.float32, -bnd2, bnd2),
    }


def _reference_forward(x, params):
    """Pure-JAX reference of the same forward (full f32 precision)."""
    hp = jax.lax.Precision.HIGHEST
    h = jnp.dot(x, params["w1"], precision=hp) + params["b1"]
    h = jnp.where(h > 0, h, 0.01 * h)
    y = jnp.dot(h, params["w2"], precision=hp) + params["b2"]
    y = jnp.where(y > 0, y, 0.01 * y)
    return y + x


if __name__ == "__main__":
    NUM_FEATURES = 128   # lane-dense last dim
    HIDDEN_SIZE = 256
    B, T = 2, 128        # 256 rows after flattening -> 2 parallel row blocks

    key = jax.random.PRNGKey(0)
    k_x, k_p = jax.random.split(key)

    x = jax.random.normal(k_x, (B, T, NUM_FEATURES), jnp.float32)
    params = _init_params(k_p, NUM_FEATURES, HIDDEN_SIZE)

    out = feedforward_forward(x, params)
    out = jax.block_until_ready(out)

    ref = _reference_forward(x, params)
    np.testing.assert_allclose(np.asarray(out), np.asarray(ref), rtol=1e-3, atol=1e-3)

    print("KERNEL_OK")
</pallas_src>

<mosaic_0001>
module attributes {stable_mosaic.version = 11 : i64} {
  func.func @_feedforward_kernel(%arg0: i32, %arg1: memref<128x128xf32, #tpu.memory_space<vmem>>, %arg2: memref<128x256xf32, #tpu.memory_space<vmem>>, %arg3: memref<1x256xf32, #tpu.memory_space<vmem>>, %arg4: memref<256x128xf32, #tpu.memory_space<vmem>>, %arg5: memref<1x128xf32, #tpu.memory_space<vmem>>, %arg6: memref<128x128xf32, #tpu.memory_space<vmem>>) attributes {dimension_semantics = [#tpu.dimension_semantics<parallel>], iteration_bounds = array<i64: 2>, scalar_prefetch = 0 : i64, scratch_operands = 0 : i64, tpu.core_type = #tpu.core_type<tc>, window_params = [{transform_indices = @transform_0, window_bounds = array<i64: 128, 128>}, {pipeline_mode = #tpu.pipeline_mode<synchronous>, transform_indices = @transform_1, window_bounds = array<i64: 128, 256>}, {pipeline_mode = #tpu.pipeline_mode<synchronous>, transform_indices = @transform_2, window_bounds = array<i64: 1, 256>}, {pipeline_mode = #tpu.pipeline_mode<synchronous>, transform_indices = @transform_3, window_bounds = array<i64: 256, 128>}, {pipeline_mode = #tpu.pipeline_mode<synchronous>, transform_indices = @transform_4, window_bounds = array<i64: 1, 128>}, {transform_indices = @transform_5, window_bounds = array<i64: 128, 128>}]} {
    %c0 = arith.constant 0 : index
    %c0_0 = arith.constant 0 : index
    %0 = vector.load %arg1[%c0, %c0_0] : memref<128x128xf32, #tpu.memory_space<vmem>>, vector<128x128xf32>
    %c0_1 = arith.constant 0 : index
    %c0_2 = arith.constant 0 : index
    %1 = vector.load %arg2[%c0_1, %c0_2] : memref<128x256xf32, #tpu.memory_space<vmem>>, vector<128x256xf32>
    %cst = arith.constant dense<0.000000e+00> : vector<128x256xf32>
    %2 = tpu.matmul %0, %1, %cst {dimension_numbers = #tpu.dot_dimension_numbers<[1], [0], [0], [1], [0, 0, 1, 1], [], []>} : vector<128x128xf32>, vector<128x256xf32>, vector<128x256xf32> -> vector<128x256xf32>
    %c0_3 = arith.constant 0 : index
    %c0_4 = arith.constant 0 : index
    %3 = vector.load %arg3[%c0_3, %c0_4] : memref<1x256xf32, #tpu.memory_space<vmem>>, vector<1x256xf32>
    %4 = vector.broadcast %3 : vector<1x256xf32> to vector<128x256xf32>
    %5 = arith.addf %2, %4 : vector<128x256xf32>
    %cst_5 = arith.constant 0.00999999977 : f32
    %6 = vector.broadcast %cst_5 : f32 to vector<128x256xf32>
    %7 = arith.mulf %6, %5 : vector<128x256xf32>
    %8 = arith.maximumf %5, %7 : vector<128x256xf32>
    %c0_6 = arith.constant 0 : index
    %c0_7 = arith.constant 0 : index
    %9 = vector.load %arg4[%c0_6, %c0_7] : memref<256x128xf32, #tpu.memory_space<vmem>>, vector<256x128xf32>
    %cst_8 = arith.constant dense<0.000000e+00> : vector<128x128xf32>
    %10 = tpu.matmul %8, %9, %cst_8 {dimension_numbers = #tpu.dot_dimension_numbers<[1], [0], [0], [1], [0, 0, 1, 1], [], []>} : vector<128x256xf32>, vector<256x128xf32>, vector<128x128xf32> -> vector<128x128xf32>
    %c0_9 = arith.constant 0 : index
    %c0_10 = arith.constant 0 : index
    %11 = vector.load %arg5[%c0_9, %c0_10] : memref<1x128xf32, #tpu.memory_space<vmem>>, vector<1x128xf32>
    %12 = vector.broadcast %11 : vector<1x128xf32> to vector<128x128xf32>
    %13 = arith.addf %10, %12 : vector<128x128xf32>
    %cst_11 = arith.constant 0.00999999977 : f32
    %14 = vector.broadcast %cst_11 : f32 to vector<128x128xf32>
    %15 = arith.mulf %14, %13 : vector<128x128xf32>
    %16 = arith.maximumf %13, %15 : vector<128x128xf32>
    %c0_12 = arith.constant 0 : index
    %c0_13 = arith.constant 0 : index
    %17 = vector.load %arg1[%c0_12, %c0_13] : memref<128x128xf32, #tpu.memory_space<vmem>>, vector<128x128xf32>
    %18 = arith.addf %16, %17 : vector<128x128xf32>
    %c0_14 = arith.constant 0 : index
    %c0_15 = arith.constant 0 : index
    %19 = vector.load %arg6[%c0_14, %c0_15] : memref<128x128xf32, #tpu.memory_space<vmem>>, vector<128x128xf32>
    tpu.vector_store %arg6[%c0_14, %c0_15], %18 {strides = array<i32>} : memref<128x128xf32, #tpu.memory_space<vmem>>, vector<128x128xf32>,
    return
  }
  func.func @transform_0(%arg0: i32) -> (i32, i32) {
    %c0_i32 = arith.constant 0 : i32
    %c0_i32_0 = arith.constant 0 : i32
    return %arg0, %c0_i32 : i32, i32
  }
  func.func @transform_1(%arg0: i32) -> (i32, i32) {
    %c0_i32 = arith.constant 0 : i32
    %c0_i32_0 = arith.constant 0 : i32
    %c0_i32_1 = arith.constant 0 : i32
    return %c0_i32, %c0_i32_0 : i32, i32
  }
  func.func @transform_2(%arg0: i32) -> (i32, i32) {
    %c0_i32 = arith.constant 0 : i32
    %c0_i32_0 = arith.constant 0 : i32
    %c0_i32_1 = arith.constant 0 : i32
    return %c0_i32, %c0_i32_0 : i32, i32
  }
  func.func @transform_3(%arg0: i32) -> (i32, i32) {
    %c0_i32 = arith.constant 0 : i32
    %c0_i32_0 = arith.constant 0 : i32
    %c0_i32_1 = arith.constant 0 : i32
    return %c0_i32, %c0_i32_0 : i32, i32
  }
  func.func @transform_4(%arg0: i32) -> (i32, i32) {
    %c0_i32 = arith.constant 0 : i32
    %c0_i32_0 = arith.constant 0 : i32
    %c0_i32_1 = arith.constant 0 : i32
    return %c0_i32, %c0_i32_0 : i32, i32
  }
  func.func @transform_5(%arg0: i32) -> (i32, i32) {
    %c0_i32 = arith.constant 0 : i32
    %c0_i32_0 = arith.constant 0 : i32
    return %arg0, %c0_i32 : i32, i32
  }
}

module attributes {stable_mosaic.version = 11 : i64} {
  func.func @_feedforward_kernel(%arg0: i32, %arg1: memref<128x128xf32, #tpu.memory_space<vmem>>, %arg2: memref<128x256xf32, #tpu.memory_space<vmem>>, %arg3: memref<1x256xf32, #tpu.memory_space<vmem>>, %arg4: memref<256x128xf32, #tpu.memory_space<vmem>>, %arg5: memref<1x128xf32, #tpu.memory_space<vmem>>, %arg6: memref<128x128xf32, #tpu.memory_space<vmem>>) attributes {dimension_semantics = [#tpu.dimension_semantics<parallel>], iteration_bounds = array<i64: 2>, scalar_prefetch = 0 : i64, scratch_operands = 0 : i64, tpu.core_type = #tpu.core_type<tc>, window_params = [{transform_indices = @transform_0, window_bounds = array<i64: 128, 128>}, {pipeline_mode = #tpu.pipeline_mode<synchronous>, transform_indices = @transform_1, window_bounds = array<i64: 128, 256>}, {pipeline_mode = #tpu.pipeline_mode<synchronous>, transform_indices = @transform_2, window_bounds = array<i64: 1, 256>}, {pipeline_mode = #tpu.pipeline_mode<synchronous>, transform_indices = @transform_3, window_bounds = array<i64: 256, 128>}, {pipeline_mode = #tpu.pipeline_mode<synchronous>, transform_indices = @transform_4, window_bounds = array<i64: 1, 128>}, {transform_indices = @transform_5, window_bounds = array<i64: 128, 128>}]} {
    %c0 = arith.constant 0 : index
    %c0_0 = arith.constant 0 : index
    %0 = vector.load %arg1[%c0, %c0_0] : memref<128x128xf32, #tpu.memory_space<vmem>>, vector<128x128xf32>
    %c0_1 = arith.constant 0 : index
    %c0_2 = arith.constant 0 : index
    %1 = vector.load %arg2[%c0_1, %c0_2] : memref<128x256xf32, #tpu.memory_space<vmem>>, vector<128x256xf32>
    %cst = arith.constant dense<0.000000e+00> : vector<128x256xf32>
    %2 = tpu.matmul %0, %1, %cst {dimension_numbers = #tpu.dot_dimension_numbers<[1], [0], [0], [1], [0, 0, 1, 1], [], []>} : vector<128x128xf32>, vector<128x256xf32>, vector<128x256xf32> -> vector<128x256xf32>
    %c0_3 = arith.constant 0 : index
    %c0_4 = arith.constant 0 : index
    %3 = vector.load %arg3[%c0_3, %c0_4] : memref<1x256xf32, #tpu.memory_space<vmem>>, vector<1x256xf32>
    %4 = vector.broadcast %3 : vector<1x256xf32> to vector<128x256xf32>
    %5 = arith.addf %2, %4 : vector<128x256xf32>
    %cst_5 = arith.constant 0.00999999977 : f32
    %6 = vector.broadcast %cst_5 : f32 to vector<128x256xf32>
    %7 = arith.mulf %6, %5 : vector<128x256xf32>
    %8 = arith.maximumf %5, %7 : vector<128x256xf32>
    %c0_6 = arith.constant 0 : index
    %c0_7 = arith.constant 0 : index
    %9 = vector.load %arg4[%c0_6, %c0_7] : memref<256x128xf32, #tpu.memory_space<vmem>>, vector<256x128xf32>
    %cst_8 = arith.constant dense<0.000000e+00> : vector<128x128xf32>
    %10 = tpu.matmul %8, %9, %cst_8 {dimension_numbers = #tpu.dot_dimension_numbers<[1], [0], [0], [1], [0, 0, 1, 1], [], []>} : vector<128x256xf32>, vector<256x128xf32>, vector<128x128xf32> -> vector<128x128xf32>
    %c0_9 = arith.constant 0 : index
    %c0_10 = arith.constant 0 : index
    %11 = vector.load %arg5[%c0_9, %c0_10] : memref<1x128xf32, #tpu.memory_space<vmem>>, vector<1x128xf32>
    %12 = vector.broadcast %11 : vector<1x128xf32> to vector<128x128xf32>
    %13 = arith.addf %10, %12 : vector<128x128xf32>
    %cst_11 = arith.constant 0.00999999977 : f32
    %14 = vector.broadcast %cst_11 : f32 to vector<128x128xf32>
    %15 = arith.mulf %14, %13 : vector<128x128xf32>
    %16 = arith.maximumf %13, %15 : vector<128x128xf32>
    %c0_12 = arith.constant 0 : index
    %c0_13 = arith.constant 0 : index
    %17 = vector.load %arg1[%c0_12, %c0_13] : memref<128x128xf32, #tpu.memory_space<vmem>>, vector<128x128xf32>
    %18 = arith.addf %16, %17 : vector<128x128xf32>
    %c0_14 = arith.constant 0 : index
    %c0_15 = arith.constant 0 : index
    %19 = vector.load %arg6[%c0_14, %c0_15] : memref<128x128xf32, #tpu.memory_space<vmem>>, vector<128x128xf32>
    tpu.vector_store %arg6[%c0_14, %c0_15], %18 {strides = array<i32>} : memref<128x128xf32, #tpu.memory_space<vmem>>, vector<128x128xf32>,
    return
  }
  func.func @transform_0(%arg0: i32) -> (i32, i32) {
    %c0_i32 = arith.constant 0 : i32
    %c0_i32_0 = arith.constant 0 : i32
    return %arg0, %c0_i32 : i32, i32
  }
  func.func @transform_1(%arg0: i32) -> (i32, i32) {
    %c0_i32 = arith.constant 0 : i32
    %c0_i32_0 = arith.constant 0 : i32
    %c0_i32_1 = arith.constant 0 : i32
    return %c0_i32, %c0_i32_0 : i32, i32
  }
  func.func @transform_2(%arg0: i32) -> (i32, i32) {
    %c0_i32 = arith.constant 0 : i32
    %c0_i32_0 = arith.constant 0 : i32
    %c0_i32_1 = arith.constant 0 : i32
    return %c0_i32, %c0_i32_0 : i32, i32
  }
  func.func @transform_3(%arg0: i32) -> (i32, i32) {
    %c0_i32 = arith.constant 0 : i32
    %c0_i32_0 = arith.constant 0 : i32
    %c0_i32_1 = arith.constant 0 : i32
    return %c0_i32, %c0_i32_0 : i32, i32
  }
  func.func @transform_4(%arg0: i32) -> (i32, i32) {
    %c0_i32 = arith.constant 0 : i32
    %c0_i32_0 = arith.constant 0 : i32
    %c0_i32_1 = arith.constant 0 : i32
    return %c0_i32, %c0_i32_0 : i32, i32
  }
  func.func @transform_5(%arg0: i32) -> (i32, i32) {
    %c0_i32 = arith.constant 0 : i32
    %c0_i32_0 = arith.constant 0 : i32
    return %arg0, %c0_i32 : i32, i32
  }
}

</mosaic_0001>

<bundles_post_ra>
// kernel: tpu_custom_call.1
= control target key start
LH: loop header
LB: loop body
LE: loop exit
PB: predicated region body
PF: predicated region fallthrough
CT: control target
= control target key end

     0   :  { %10 = vsyncpa [#allocation3], 0  ;;  %s1772_s0 = inlined_call_operand.hbm [shape: f32[256,128], index: 0, kind: input, shape index: {}]   ;;  %s1773_s1 = inlined_call_operand.hbm [shape: f32[128,256], index: 1, kind: input, shape index: {}]   ;;  %s1774_s2 = inlined_call_operand.vmem [shape: f32[1,256], index: 2, kind: input, shape index: {}]   ;;  %s1775_s3 = inlined_call_operand.hbm [shape: f32[256,128], index: 3, kind: input, shape index: {}]   ;;  %s1776_s4 = inlined_call_operand.vmem [shape: f32[1,128], index: 4, kind: input, shape index: {}]   ;;  %s1777_s5 = inlined_call_operand.hbm [shape: f32[256,128], index: 5, kind: output, shape index: {}]  }
   0x1   :  { %12 = vsyncpa [#allocation3 + $0x1], 0 }
   0x2   :  { %13 = vsyncpa [#allocation6], 0 }
   0x3   :  { %14 = vsyncpa [#allocation4], 0 }
   0x4   :  { %16 = vsyncpa [#allocation4 + $0x1], 0  ;;  %s1351_s18 = smov 0   ;;  %s1353_s19 = smov 0  }
   0x5   :  { %s1355_s20 = smov 0   ;;  %s1357_s21 = smov 0  }
   0x6 LB: > { %s1372_s22 = sadd.s32 4294967295, %s1308_s21   ;;  %s913_s23 = sadd.s32 4294967294, %s1308_s21   ;;  %s1308_s21 = sphi %s1357_s21, %s1797_s21   ;;  %s1304_s20 = sphi %s1355_s20, %s1796_s20   ;;  %s1300_s19 = sphi %s1353_s19, %s1795_s19   ;;  %s1296_s18 = sphi %s1351_s18, %s1794_s18  }
   0x7   : > { %p42_p0 = scmp.ne.s32.totalorder %s1300_s19, %s1296_s18  ;;  %p1778_p1 = scmp.eq.s32.totalorder %s1372_s22, 0 }
   0x8   : > { %p156_p3 = scmp.eq.s32.totalorder %s913_s23, 1  ;;  %p914_p5 = scmp.ge.s32.totalorder %s1308_s21, 1 }
   0x9   : > { %p1381_p4 = por %p1778_p1, %p42_p0  ;;  %p163_p7 = scmp.lt.s32.totalorder %s1308_s21, 3 }
   0xa   : > { %p1386_p6 = por %p156_p3, %p42_p0  ;;  %s1310_s27 = smov [#allocation5]  }
   0xb   : > { %s1781_s24 = scalar_select %p1381_p4, 1, 0 }
   0xc   : > { %s1782_s25 = scalar_select %p1386_p6, 1, 0 }
   0xd   : > { %p1391_p8 = pnand %p914_p5, %p163_p7  ;;  %s175_s28 = sshll.u32 %s1310_s27, 4  ;;  %s1395_s28 = int_to_ptr.vmem [resolvable:$true] %s175_s28 }
   0xe   : > { %s1311_s30 = smov [#allocation7]   ;;  %s1152_s9 = scalar_lea.hbm %s1773_s1, 4096 }
   0xf   : > { %p1090_p9 = pneg %p1391_p8  ;;  %s191_s6 = sshll.u32 %s1311_s30, 4  ;;  %s1406_s6 = int_to_ptr.vmem [resolvable:$true] %s191_s6 }
  0x10   : > { %p1153_p12 = scmp.ne.s32.totalorder %s1773_s1, %s1152_s9  ;;  %p1159_p5 = scmp.lt.u32.totalorder %s1152_s9, %s1773_s1 }
  0x11   : > { %p1402_p11 = pnand %p1090_p9, %p1778_p1 }
  0x13   : > { %p1154_p13 = pneg %p1402_p11 }
  0x15   : > { %p1155_p0 = pnand %p1154_p13, %p1153_p12 }
  0x17   : > { %p1156_p3 = pneg %p1155_p0 }
  0x19   : > { %p1161_p7 = pnand %p1159_p5, %p1156_p3 }
  0x1b   : > { %1164 = shalt.err (!%p1161_p7)
}
  0x1c   : > { %s1165_s14 = scalar_lea.vmem %s1395_s28, 4096  ;;  %p1173_p2 = scmp.lt.s32.totalorder %s1395_s28, %s1395_s28 }
  0x1d   : > { %p1166_p9 = scmp.ne.s32.totalorder %s1395_s28, %s1165_s14  ;;  %p1174_p12 = scmp.lt.s32.totalorder %s1165_s14, %s1165_s14 }
  0x1f   : > { %p1168_p10 = pnand %p1166_p9, %p1154_p13  ;;  %p1175_p0 = por %p1174_p12, %p1173_p2 }
  0x21   : > { %p1169_p1 = pneg %p1168_p10 }
  0x23   : > { %p1176_p6 = pnand %p1175_p0, %p1169_p1 }
  0x25   : > { %1179 = shalt.err (!%p1176_p6)
}
  0x26   : > { %s1312_s15 = smov 256   ;;  %s1313_s16 = smov 16  }
  0x27   : > { %1093 = dma.hbm_to_vmem [thread:$0]  (!%p1402_p11), %s1773_s1, 4096, %s1395_s28, [#allocation6], %s1312_s15, %s1312_s15, %s1313_s16  }
  0x28   : > { %s1180_s7 = scalar_lea.hbm %s1775_s3, 4096 }
  0x29   : > { %p1181_p2 = scmp.ne.s32.totalorder %s1775_s3, %s1180_s7  ;;  %p1187_p10 = scmp.lt.u32.totalorder %s1180_s7, %s1775_s3 }
  0x2b   : > { %p1183_p1 = pnand %p1181_p2, %p1154_p13 }
  0x2d   : > { %p1184_p6 = pneg %p1183_p1 }
  0x2f   : > { %p1189_p3 = pnand %p1187_p10, %p1184_p6 }
  0x31   : > { %1192 = shalt.err (!%p1189_p3)
}
  0x32   : > { %s1193_s28 = scalar_lea.vmem %s1406_s6, 4096  ;;  %p1201_p12 = scmp.lt.s32.totalorder %s1406_s6, %s1406_s6 }
  0x33   : > { %p1194_p5 = scmp.ne.s32.totalorder %s1406_s6, %s1193_s28  ;;  %p1202_p0 = scmp.lt.s32.totalorder %s1193_s28, %s1193_s28 }
  0x35   : > { %p1196_p7 = pnand %p1194_p5, %p1154_p13  ;;  %p1203_p2 = por %p1202_p0, %p1201_p12 }
  0x37   : > { %p1197_p9 = pneg %p1196_p7 }
  0x39   : > { %p1204_p1 = pnand %p1203_p2, %p1197_p9 }
  0x3b   : > { %1207 = shalt.err (!%p1204_p1)
}
  0x3c   : > { %s1314_s12 = smov 128   ;;  %s1315_s13 = smov 8  }
  0x3d   : > { %1096 = dma.hbm_to_vmem [thread:$0]  (!%p1402_p11), %s1775_s3, 4096, %s1406_s6, [#allocation6], %s1314_s12, %s1314_s12, %s1315_s13  }
  0x3e   : > { %s1464_s16 = sadd.s32 1, %s1308_s21   ;;  %s29_s23 = sadd.s32 1, %s1304_s20 }
  0x3f   : > { %s26_s17 = ssub.s32 %s1308_s21, %s1464_s16  ;;  %p36_p6 = scmp.ne.s32.totalorder %s1304_s20, %s1300_s19 }
  0x40   : > { %p27_p13 = scmp.eq.s32.totalorder %s26_s17, 0  ;;  %p37_p10 = scmp.eq.s32.totalorder %s1308_s21, 0 }
  0x41   : > { %p1785_p5 = scmp.eq.s32.totalorder %s1372_s22, 1  ;;  %p1107_p9 = scmp.lt.s32.totalorder %s1308_s21, 2 }
  0x42   : > { %s1473_s27 = scalar_select %p27_p13, %s1304_s20, %s29_s23  }
  0x43   : > { %p38_p3 = por %p37_p10, %p36_p6  ;;  %p1477_p7 = por %p1785_p5, %p36_p6 }
  0x44   : > { %s208_s30 = sand.u32 1, %s1304_s20   ;;  %s932_s6 = sshll.u32 %s1308_s21, 11 }
  0x45   : > { %s1786_s29 = scalar_select %p1477_p7, 1, 0 }
  0x46   : > { %s918_s7 = sshll.u32 %s208_s30, 7  ;;  %s1487_s10 = scalar_lea.hbm %s1772_s0, %s932_s6 }
  0x47   : > { %s212_s11 = scalar_lea.vmem [#allocation2], %s918_s7  ;;  %p1491_p11 = pnand %p1107_p9, %p38_p3 }
  0x48   : > { %s219_s28 = sshll.u32 %s212_s11, 4  ;;  %s1495_s15 = scalar_lea.sflag [#allocation3], %s208_s30  ;;  %s1489_s28 = int_to_ptr.vmem [resolvable:$true] %s219_s28 }
  0x49   : > { %s1208_s17 = scalar_lea.hbm %s1487_s10, 2048  ;;  %p1210_p0 = pneg %p1491_p11 }
  0x4a   : > { %p1209_p12 = scmp.ne.s32.totalorder %s1487_s10, %s1208_s17  ;;  %s1213_s6 = scalar_lea.hbm %s1772_s0, 4096 }
  0x4b   : > { %p1214_p13 = scmp.lt.u32.totalorder %s1487_s10, %s1772_s0  ;;  %p1215_p6 = scmp.lt.u32.totalorder %s1213_s6, %s1208_s17 }
  0x4c   : > { %p1211_p2 = pnand %p1210_p0, %p1209_p12  ;;  %p1217_p3 = scmp.lt.u32.totalorder %s1208_s17, %s1487_s10 }
  0x4d   : > { %p1216_p10 = por %p1215_p6, %p1214_p13 }
  0x4e   : > { %p1212_p1 = pneg %p1211_p2 }
  0x4f   : > { %p1218_p5 = por %p1217_p3, %p1216_p10 }
  0x51   : > { %p1219_p9 = pnand %p1218_p5, %p1212_p1 }
  0x53   : > { %1222 = shalt.err (!%p1219_p9)
}
  0x54   : > { %s1223_s30 = scalar_lea.vmem %s1489_s28, 2048  ;;  %s1316_s11 = smov [#allocation2]  }
  0x55   : > { %p1224_p12 = scmp.ne.s32.totalorder %s1489_s28, %s1223_s30  ;;  %s1228_s23 = sshll.u32 %s1316_s11, 4  ;;  %s1229_s23 = int_to_ptr.vmem [resolvable:$false] %s1228_s23 }
  0x56   : > { %s1230_s7 = scalar_lea.vmem %s1229_s23, 4096  ;;  %p1231_p4 = scmp.lt.s32.totalorder %s1489_s28, %s1229_s23 }
  0x57   : > { %p1226_p2 = pnand %p1224_p12, %p1210_p0  ;;  %p1232_p13 = scmp.lt.s32.totalorder %s1230_s7, %s1223_s30 }
  0x59   : > { %p1227_p7 = pneg %p1226_p2  ;;  %p1233_p6 = por %p1232_p13, %p1231_p4 }
  0x5b   : > { %p1234_p10 = pnand %p1233_p6, %p1227_p7 }
  0x5d   : > { %1237 = shalt.err (!%p1234_p10)
}
  0x5e   : > { %1100 = dma.hbm_to_vmem [thread:$0]  (!%p1491_p11), %s1487_s10, 2048, %s1489_s28, %s1495_s15, %s1314_s12, %s1314_s12, %s1315_s13  }
  0x5f   : > { %231 = sbr.rel (%p1391_p8) target bundleno = 659 (0x293), region = 40  ;;  %s1529_s17 = sand.u32 (!%p1391_p8), 1, %s1300_s19  }
  0x60   : > { %s922_s6 = sshll.u32 (!%p1391_p8), %s1529_s17, 7  ;;  %s234_s8 = scalar_lea.sflag (!%p1391_p8), [#allocation3], %s1529_s17 }
  0x61   : > { %s1535_s14 = scalar_lea.vmem (!%p1391_p8), [#allocation2], %s922_s6  ;;  %p1788_p4 = scmp.ne.s32.totalorder (!%p1391_p8), %s1781_s24, 0 }
  0x66   : > { %1283 = dma.done.wait (%p1788_p4), %s234_s8, 2048  }
  0x67   : > { %1285 = vsyncadd (%p1788_p4), %s234_s8, 4294965248  ;;  %p1789_p7 = scmp.eq.s32.totalorder %s1372_s22, 0 }
  0x69   : > { %1287 = dma.done.wait (%p1789_p7), [#allocation6], 8192   ;;  %p1790_p8 = pmov %p1789_p7 }
  0x6a   : > { %v1317_v0 = vmov 0.0   ;;  %v291_v1 = vld [vmem:[#allocation5 + $0x8] sm:$0xff]  ;;  %v293_v2 = vld [vmem:[#allocation5 + $0x18] sm:$0xff]  ;;  %v290_v3 = vld [vmem:[#allocation5] sm:$0xff]  ;;  %s1674_s10 = scalar_lea.vmem [#allocation8], %s922_s6  ;;  %s933_s28 = sshll.u32 %s1372_s22, 11 }
  0x6b   : > { %1289 = vsyncadd (%p1790_p8), [#allocation6], 4294959104  ;;  %398 = vmatprep.mubr.f32.mxu0 %v1317_v0  ;;  %v1014_v4 = vpack.c.bf16 %v293_v2, %v291_v1  ;;  %v292_v5 = vld [vmem:[#allocation5 + $0x10] sm:$0xff]  ;;  %v295_v6 = vld [vmem:[#allocation5 + $0x28] sm:$0xff]  ;;  %s821_s15 = sshll.u32 %s1674_s10, 4  ;;  %s1724_s11 = scalar_lea.hbm %s1777_s5, %s933_s28  ;;  %s1726_s15 = int_to_ptr.vmem [resolvable:$true] %s821_s15 }
  0x6c   : > { %v297_v7 = vld [vmem:[#allocation5 + $0x38] sm:$0xff]  ;;  %v1016_v8 = vpack.c.bf16 %v292_v5, %v290_v3  ;;  %v294_v10 = vld [vmem:[#allocation5 + $0x20] sm:$0xff]  ;;  %v296_v11 = vld [vmem:[#allocation5 + $0x30] sm:$0xff]  ;;  %s808_s23 = scalar_lea.sflag [#allocation4], %s1529_s17  ;;  %s1238_s7 = scalar_lea.vmem %s1726_s15, 2048 }
  0x6d   : > { %v1018_v9 = vpack.c.bf16 %v297_v7, %v295_v6  ;;  %v299_v12 = vld [vmem:[#allocation5 + $0x48] sm:$0xff]  ;;  %1015 = vmatprep.subr.bf16.mxu0 %v1014_v4  ;;  %v301_v13 = vld [vmem:[#allocation5 + $0x58] sm:$0xff]  ;;  %v1020_v14 = vpack.c.bf16 %v296_v11, %v294_v10  ;;  %v298_v16 = vld [vmem:[#allocation5 + $0x40] sm:$0xff]  ;;  %p1239_p11 = scmp.ne.s32.totalorder %s1726_s15, %s1238_s7  ;;  %p1791_p0 = scmp.ne.s32.totalorder %s1786_s29, 0 }
  0x6e   : > { %1017 = vmatpush1.bf16.msra.mxu0 %v1016_v8  ;;  %v1022_v15 = vpack.c.bf16 %v301_v13, %v299_v12  ;;  %v300_v17 = vld [vmem:[#allocation5 + $0x50] sm:$0xff]  ;;  %v303_v18 = vld [vmem:[#allocation5 + $0x68] sm:$0xff]  ;;  %v305_v19 = vld [vmem:[#allocation5 + $0x78] sm:$0xff]  ;;  %s1318_s22 = smov [#allocation8]  }
  0x6f   : > { %1019 = vmatprep.subr.bf16.mxu0 %v1018_v9  ;;  %v1024_v20 = vpack.c.bf16 %v300_v17, %v298_v16  ;;  %v1026_v21 = vpack.c.bf16 %v305_v19, %v303_v18  ;;  %v302_v22 = vld [vmem:[#allocation5 + $0x60] sm:$0xff]  ;;  %v304_v23 = vld [vmem:[#allocation5 + $0x70] sm:$0xff]  ;;  %v307_v24 = vld [vmem:[#allocation5 + $0x88] sm:$0xff]  ;;  %p1240_p1 = pnand %p1239_p11, %p1791_p0  ;;  %s1242_s6 = sshll.u32 %s1318_s22, 4  ;;  %s1243_s6 = int_to_ptr.vmem [resolvable:$false] %s1242_s6 }
  0x70   : > { %v309_v25 = vld [vmem:[#allocation5 + $0x98] sm:$0xff]  ;;  %v1028_v26 = vpack.c.bf16 %v304_v23, %v302_v22  ;;  %v306_v28 = vld [vmem:[#allocation5 + $0x80] sm:$0xff]  ;;  %v308_v29 = vld [vmem:[#allocation5 + $0x90] sm:$0xff]  ;;  %s1244_s8 = scalar_lea.vmem %s1243_s6, 4096  ;;  %p1245_p5 = scmp.lt.s32.totalorder %s1726_s15, %s1243_s6 }
  0x71   : > { %v1030_v27 = vpack.c.bf16 %v309_v25, %v307_v24  ;;  %v311_v30 = vld [vmem:[#allocation5 + $0xa8] sm:$0xff]  ;;  %v313_v31 = vld [vmem:[#allocation5 + $0xb8] sm:$0xff]  ;;  %v310_v32 = vld [vmem:[#allocation5 + $0xa0] sm:$0xff]  ;;  %v1032_v34 = vpack.c.bf16 %v308_v29, %v306_v28  ;;  %p1241_p3 = pneg %p1240_p1  ;;  %p1246_p9 = scmp.lt.s32.totalorder %s1244_s8, %s1238_s7 }
  0x72   : > { %1021 = vmatpush1.bf16.msra.mxu0 %v1020_v14  ;;  %v312_v33 = vld [vmem:[#allocation5 + $0xb0] sm:$0xff]  ;;  %v315_v35 = vld [vmem:[#allocation5 + $0xc8] sm:$0xff]  ;;  %v317_v36 = vld [vmem:[#allocation5 + $0xd8] sm:$0xff]  ;;  %v1034_v40 = vpack.c.bf16 %v313_v31, %v311_v30 }
  0x73   : > { %1023 = vmatprep.subr.bf16.mxu0 %v1022_v15  ;;  %v575_v37 = vld [vmem:[#allocation7 + $0x80] sm:$0xff]  ;;  %v576_v38 = vld [vmem:[#allocation7 + $0x88] sm:$0xff]  ;;  %v577_v43 = vld [vmem:[#allocation7 + $0x90] sm:$0xff]  ;;  %v1036_v51 = vpack.c.bf16 %v312_v33, %v310_v32  ;;  %v1038_v55 = vpack.c.bf16 %v317_v36, %v315_v35  ;;  %p1247_p12 = por %p1246_p9, %p1245_p5 }
  0x74   : > { %v559_v39 = vld [vmem:[#allocation7] sm:$0xff]  ;;  %v1046_v41 = vpack.c.bf16 %v576_v38, %v575_v37  ;;  %v560_v42 = vld [vmem:[#allocation7 + $0x8] sm:$0xff]  ;;  %v578_v44 = vld [vmem:[#allocation7 + $0x98] sm:$0xff] }
  0x75   : > { %v1048_v45 = vpack.c.bf16 %v560_v42, %v559_v39  ;;  %v1050_v46 = vpack.c.bf16 %v578_v44, %v577_v43  ;;  %v561_v47 = vld [vmem:[#allocation7 + $0x10] sm:$0xff]  ;;  %v562_v48 = vld [vmem:[#allocation7 + $0x18] sm:$0xff]  ;;  %v579_v49 = vld [vmem:[#allocation7 + $0xa0] sm:$0xff]  ;;  %p1248_p2 = pnand %p1247_p12, %p1241_p3 }
  0x76   : > { %1025 = vmatpush1.bf16.msra.mxu0 %v1024_v20  ;;  %1047 = vmatprep.subr.bf16.mxu1 %v1046_v41  ;;  %v580_v50 = vld [vmem:[#allocation7 + $0xa8] sm:$0xff]  ;;  %v314_v52 = vld [vmem:[#allocation5 + $0xc0] sm:$0xff]  ;;  %v316_v53 = vld [vmem:[#allocation5 + $0xd0] sm:$0xff]  ;;  %v1052_v54 = vpack.c.bf16 %v562_v48, %v561_v47 }
  0x77   : > { %1027 = vmatprep.subr.bf16.mxu0 %v1026_v21  ;;  %1049 = vmatpush3.bf16.msra.mxu1 %v1048_v45  ;;  %v319_v56 = vld [vmem:[#allocation5 + $0xe8] sm:$0xff]  ;;  %v1054_v57 = vpack.c.bf16 %v580_v50, %v579_v49  ;;  %v563_v58 = vld [vmem:[#allocation7 + $0x20] sm:$0xff]  ;;  %v321_v60 = vld [vmem:[#allocation5 + $0xf8] sm:$0xff]  ;;  %v1040_v63 = vpack.c.bf16 %v316_v53, %v314_v52 }
  0x78   : > { %1051 = vmatprep.subr.bf16.mxu1 %v1050_v46  ;;  %v564_v59 = vld [vmem:[#allocation7 + $0x28] sm:$0xff]  ;;  %v581_v61 = vld [vmem:[#allocation7 + $0xb0] sm:$0xff]  ;;  %v582_v62 = vld [vmem:[#allocation7 + $0xb8] sm:$0xff]  ;;  %v1042_v3 = vpack.c.bf16 %v321_v60, %v319_v56 }
  0x79   : > { %v318_v1 = vld [vmem:[#allocation5 + $0xe0] sm:$0xff]  ;;  %v1056_v2 = vpack.c.bf16 %v564_v59, %v563_v58  ;;  %v320_v4 = vld [vmem:[#allocation5 + $0xf0] sm:$0xff]  ;;  %v1058_v5 = vpack.c.bf16 %v582_v62, %v581_v61  ;;  %v566_v7 = vld [vmem:[#allocation7 + $0x38] sm:$0xff] }
  0x7a   : > { %1029 = vmatpush1.bf16.msra.mxu0 %v1028_v26  ;;  %v565_v6 = vld [vmem:[#allocation7 + $0x30] sm:$0xff]  ;;  %v583_v8 = vld [vmem:[#allocation7 + $0xc0] sm:$0xff]  ;;  %v584_v9 = vld [vmem:[#allocation7 + $0xc8] sm:$0xff]  ;;  %v1044_v10 = vpack.c.bf16 %v320_v4, %v318_v1 }
  0x7b   : > { %1031 = vmatprep.subr.bf16.mxu0 %v1030_v27  ;;  %1053 = vmatpush3.bf16.msra.mxu1 %v1052_v54  ;;  %v1060_v11 = vpack.c.bf16 %v566_v7, %v565_v6  ;;  %v1062_v12 = vpack.c.bf16 %v584_v9, %v583_v8  ;;  %v567_v13 = vld [vmem:[#allocation7 + $0x40] sm:$0xff]  ;;  %v568_v14 = vld [vmem:[#allocation7 + $0x48] sm:$0xff]  ;;  %v585_v15 = vld [vmem:[#allocation7 + $0xd0] sm:$0xff] }
  0x7c   : > { %1055 = vmatprep.subr.bf16.mxu1 %v1054_v57  ;;  %v586_v16 = vld [vmem:[#allocation7 + $0xd8] sm:$0xff]  ;;  %v1547_v17 = vld [vmem:[%s1535_s14] sm:$0xff]  ;;  %v1064_v18 = vpack.c.bf16 %v568_v14, %v567_v13  ;;  %v569_v20 = vld [vmem:[#allocation7 + $0x50] sm:$0xff] }
  0x7d   : > { %v1066_v19 = vpack.c.bf16 %v586_v16, %v585_v15  ;;  %v570_v21 = vld [vmem:[#allocation7 + $0x58] sm:$0xff]  ;;  %v1552_v22 = vld [vmem:[%s1535_s14 + $0x8] sm:$0xff]  ;;  %v1557_v24 = vld [vmem:[%s1535_s14 + $0x10] sm:$0xff] }
  0x7e   : > { %1033 = vmatpush1.bf16.msra.mxu0 %v1032_v34  ;;  %v1068_v23 = vpack.c.bf16 %v570_v21, %v569_v20  ;;  %v1562_v25 = vld [vmem:[%s1535_s14 + $0x18] sm:$0xff]  ;;  %v1567_v26 = vld [vmem:[%s1535_s14 + $0x20] sm:$0xff]  ;;  %v1572_v27 = vld [vmem:[%s1535_s14 + $0x28] sm:$0xff] }
  0x7f   : > { %1035 = vmatprep.subr.bf16.mxu0 %v1034_v40  ;;  %1057 = vmatpush3.bf16.msra.mxu1 %v1056_v2  ;;  %v1577_v28 = vld [vmem:[%s1535_s14 + $0x30] sm:$0xff]  ;;  %v1582_v29 = vld [vmem:[%s1535_s14 + $0x38] sm:$0xff]  ;;  %v1587_v30 = vld [vmem:[%s1535_s14 + $0x40] sm:$0xff] }
  0x80   : > { %1059 = vmatprep.subr.bf16.mxu1 %v1058_v5  ;;  %v1592_v31 = vld [vmem:[%s1535_s14 + $0x48] sm:$0xff]  ;;  %v1597_v32 = vld [vmem:[%s1535_s14 + $0x50] sm:$0xff]  ;;  %v1602_v33 = vld [vmem:[%s1535_s14 + $0x58] sm:$0xff] }
  0x81   : > { %v1607_v34 = vld [vmem:[%s1535_s14 + $0x60] sm:$0xff]  ;;  %v1612_v35 = vld [vmem:[%s1535_s14 + $0x68] sm:$0xff]  ;;  %v1617_v36 = vld [vmem:[%s1535_s14 + $0x70] sm:$0xff] }
  0x82   : > { %1037 = vmatpush1.bf16.msra.mxu0 %v1036_v51  ;;  %v1622_v37 = vld [vmem:[%s1535_s14 + $0x78] sm:$0xff]  ;;  %v587_v38 = vld [vmem:[#allocation7 + $0xe0] sm:$0xff]  ;;  %v588_v39 = vld [vmem:[#allocation7 + $0xe8] sm:$0xff] }
  0x83   : > { %1039 = vmatprep.subr.bf16.mxu0 %v1038_v55  ;;  %1061 = vmatpush3.bf16.msra.mxu1 %v1060_v11  ;;  %v1070_v40 = vpack.c.bf16 %v588_v39, %v587_v38  ;;  %v571_v41 = vld [vmem:[#allocation7 + $0x60] sm:$0xff]  ;;  %v572_v42 = vld [vmem:[#allocation7 + $0x68] sm:$0xff]  ;;  %v589_v44 = vld [vmem:[#allocation7 + $0xf0] sm:$0xff] }
  0x84   : > { %1063 = vmatprep.subr.bf16.mxu1 %v1062_v12  ;;  %v1072_v43 = vpack.c.bf16 %v572_v42, %v571_v41  ;;  %v590_v45 = vld [vmem:[#allocation7 + $0xf8] sm:$0xff]  ;;  %v573_v47 = vld [vmem:[#allocation7 + $0x70] sm:$0xff]  ;;  %v322_v52 = vld [vmem:[%s1774_s2] sm:$0x3] }
  0x85   : > { %v1074_v46 = vpack.c.bf16 %v590_v45, %v589_v44  ;;  %v574_v48 = vld [vmem:[#allocation7 + $0x78] sm:$0xff] }
  0x86   : > { %1041 = vmatpush1.bf16.msra.mxu0 %v1040_v63  ;;  %v1076_v49 = vpack.c.bf16 %v574_v48, %v573_v47 }
  0x87   : > { %1043 = vmatprep.subr.bf16.mxu0 %v1042_v3  ;;  %1065 = vmatpush3.bf16.msra.mxu1 %v1064_v18 }
  0x88   : > { %1067 = vmatprep.subr.bf16.mxu1 %v1066_v19 }
  0x8a   : > { %1045 = vmatpush1.bf16.msra.mxu0 %v1044_v10 }
  0x8b   : > { %1069 = vmatpush3.bf16.msra.mxu1 %v1068_v23 }
  0x8c   : > { %1071 = vmatprep.subr.bf16.mxu1 %v1070_v40 }
  0x8d   : > { %399 = vmatmul.mubr.f32.vlgmr.msra.gmra.mrb[0].mxu0 %v1547_v17 }
  0x8e   : > { %404 = vmatprep.mubr.f32.mxu0 %v1317_v0 }
  0x8f   : > { %1073 = vmatpush3.bf16.msra.mxu1 %v1072_v43 }
  0x90   : > { %1075 = vmatprep.subr.bf16.mxu1 %v1074_v46 }
  0x91   : > { %405 = vmatmul.mubr.f32.gmra.mrb[2].mxu0 %v1552_v22 }
  0x92   : > { %410 = vmatprep.mubr.f32.mxu0 %v1317_v0 }
  0x93   : > { %1077 = vmatpush3.bf16.msra.mxu1 %v1076_v49 }
  0x95   : > { %411 = vmatmul.mubr.f32.gmra.mrb[4].mxu0 %v1557_v24 }
  0x96   : > { %416 = vmatprep.mubr.f32.mxu0 %v1317_v0 }
  0x99   : > { %417 = vmatmul.mubr.f32.gmra.mrb[6].mxu0 %v1562_v25 }
  0x9a   : > { %422 = vmatprep.mubr.f32.mxu0 %v1317_v0 }
  0x9d   : > { %423 = vmatmul.mubr.f32.gmra.mrb[8].mxu0 %v1567_v26 }
  0x9e   : > { %428 = vmatprep.mubr.f32.mxu0 %v1317_v0 }
  0xa1   : > { %429 = vmatmul.mubr.f32.gmra.mrb[10].mxu0 %v1572_v27 }
  0xa2   : > { %434 = vmatprep.mubr.f32.mxu0 %v1317_v0 }
  0xa5   : > { %435 = vmatmul.mubr.f32.gmra.mrb[12].mxu0 %v1577_v28 }
  0xa6   : > { %440 = vmatprep.mubr.f32.mxu0 %v1317_v0 }
  0xa9   : > { %441 = vmatmul.mubr.f32.gmra.mrb[14].mxu0 %v1582_v29 }
  0xaa   : > { %446 = vmatprep.mubr.f32.mxu0 %v1317_v0 }
  0xad   : > { %447 = vmatmul.mubr.f32.gmra.mrb[16].mxu0 %v1587_v30 }
  0xae   : > { %452 = vmatprep.mubr.f32.mxu0 %v1317_v0 }
  0xb1   : > { %453 = vmatmul.mubr.f32.gmra.mrb[18].mxu0 %v1592_v31 }
  0xb2   : > { %458 = vmatprep.mubr.f32.mxu0 %v1317_v0 }
  0xb5   : > { %459 = vmatmul.mubr.f32.gmra.mrb[20].mxu0 %v1597_v32 }
  0xb6   : > { %464 = vmatprep.mubr.f32.mxu0 %v1317_v0 }
  0xb9   : > { %465 = vmatmul.mubr.f32.gmra.mrb[22].mxu0 %v1602_v33 }
  0xba   : > { %470 = vmatprep.mubr.f32.mxu0 %v1317_v0 }
  0xbd   : > { %471 = vmatmul.mubr.f32.gmra.mrb[24].mxu0 %v1607_v34 }
  0xbe   : > { %476 = vmatprep.mubr.f32.mxu0 %v1317_v0 }
  0xc1   : > { %477 = vmatmul.mubr.f32.gmra.mrb[26].mxu0 %v1612_v35 }
  0xc2   : > { %482 = vmatprep.mubr.f32.mxu0 %v1317_v0 }
  0xc5   : > { %483 = vmatmul.mubr.f32.gmra.mrb[28].mxu0 %v1617_v36 }
  0xc6   : > { %488 = vmatprep.mubr.f32.mxu0 %v1317_v0  ;;  %v324_v0 = vlaneseq }
  0xc8   : > { %v325_v50 = vshrl.u32 %v324_v0, 7 }
  0xc9   : > { %489 = vmatmul.mubr.f32.gmra.mrb[30].mxu0 %v1622_v37 }
  0xca   : > { %v326_v51 = vsub.s32 0, %v325_v50  ;;  %v330_v53 = vsub.s32 1, %v325_v50 }
  0xcc   : > { %v1628_v54 = vrot.slane %v322_v52, %v326_v51  ;;  %v1630_v55 = vrot.slane %v322_v52, %v330_v53 }
 0x160   : > { %v400_v56 = vpop.f32.mrb[0].mxu0 }
 0x161   : > { %v401_v57 = vadd.f32 %v400_v56, %v1628_v54  ;;  %v402_v58 = vpop.f32.mrb[1].mxu0 }
 0x162   : > { %v403_v59 = vadd.f32 %v402_v58, %v1630_v55 }
 0x163   : > { %v495_v60 = vmul.f32 0.01, %v401_v57 }
 0x164   : > { %v406_v61 = vpop.f32.mrb[2].mxu0  ;;  %v496_v62 = vmul.f32 0.01, %v403_v59 }
 0x165   : > { %v407_v63 = vadd.f32 %v406_v61, %v1628_v54  ;;  %v408_v1 = vpop.f32.mrb[3].mxu0  ;;  %v527_v4 = vmax.f32 %v401_v57, %v495_v60 }
 0x166   : > { %v409_v2 = vadd.f32 %v408_v1, %v1630_v55  ;;  %v528_v3 = vmax.f32 %v403_v59, %v496_v62 }
 0x167   : > { %v497_v5 = vmul.f32 0.01, %v407_v63 }
 0x168   : > { %v498_v6 = vmul.f32 0.01, %v409_v2  ;;  %v412_v7 = vpop.f32.mrb[4].mxu0  ;;  %662 = vmatprep.mubr.f32.mxu1 %v528_v3 }
 0x169   : > { %v413_v8 = vadd.f32 %v412_v7, %v1628_v54  ;;  %v414_v9 = vpop.f32.mrb[5].mxu0  ;;  %663 = vmatmul.mubr.f32.vlgmr.msra.gmra.mrb[0].mxu1 %v527_v4  ;;  %v529_v12 = vmax.f32 %v407_v63, %v497_v5 }
 0x16a   : > { %v530_v10 = vmax.f32 %v409_v2, %v498_v6  ;;  %v415_v11 = vadd.f32 %v414_v9, %v1630_v55 }
 0x16b   : > { %v499_v13 = vmul.f32 0.01, %v413_v8 }
 0x16c   : > { %v500_v14 = vmul.f32 0.01, %v415_v11  ;;  %v418_v15 = vpop.f32.mrb[6].mxu0  ;;  %667 = vmatprep.mubr.f32.mxu1 %v530_v10 }
 0x16d   : > { %v419_v16 = vadd.f32 %v418_v15, %v1628_v54  ;;  %v420_v18 = vpop.f32.mrb[7].mxu0  ;;  %668 = vmatmul.mubr.f32.gmra.mrb[2].mxu1 %v529_v12  ;;  %v531_v21 = vmax.f32 %v413_v8, %v499_v13 }
 0x16e   : > { %v532_v19 = vmax.f32 %v415_v11, %v500_v14  ;;  %v421_v20 = vadd.f32 %v420_v18, %v1630_v55 }
 0x16f   : > { %v501_v23 = vmul.f32 0.01, %v419_v16 }
 0x170   : > { %v502_v38 = vmul.f32 0.01, %v421_v20  ;;  %v424_v39 = vpop.f32.mrb[8].mxu0  ;;  %672 = vmatprep.mubr.f32.mxu1 %v532_v19 }
 0x171   : > { %v425_v40 = vadd.f32 %v424_v39, %v1628_v54  ;;  %v426_v41 = vpop.f32.mrb[9].mxu0  ;;  %673 = vmatmul.mubr.f32.gmra.mrb[4].mxu1 %v531_v21  ;;  %v533_v44 = vmax.f32 %v419_v16, %v501_v23 }
 0x172   : > { %v534_v42 = vmax.f32 %v421_v20, %v502_v38  ;;  %v427_v43 = vadd.f32 %v426_v41, %v1630_v55 }
 0x173   : > { %v503_v45 = vmul.f32 0.01, %v425_v40 }
 0x174   : > { %v504_v46 = vmul.f32 0.01, %v427_v43  ;;  %v430_v47 = vpop.f32.mrb[10].mxu0  ;;  %677 = vmatprep.mubr.f32.mxu1 %v534_v42 }
 0x175   : > { %v431_v48 = vadd.f32 %v430_v47, %v1628_v54  ;;  %v432_v49 = vpop.f32.mrb[11].mxu0  ;;  %678 = vmatmul.mubr.f32.gmra.mrb[6].mxu1 %v533_v44  ;;  %v535_v51 = vmax.f32 %v425_v40, %v503_v45 }
 0x176   : > { %v536_v0 = vmax.f32 %v427_v43, %v504_v46  ;;  %v433_v50 = vadd.f32 %v432_v49, %v1630_v55 }
 0x177   : > { %v505_v52 = vmul.f32 0.01, %v431_v48 }
 0x178   : > { %v506_v53 = vmul.f32 0.01, %v433_v50  ;;  %v436_v56 = vpop.f32.mrb[12].mxu0  ;;  %682 = vmatprep.mubr.f32.mxu1 %v536_v0 }
 0x179   : > { %v437_v57 = vadd.f32 %v436_v56, %v1628_v54  ;;  %v438_v58 = vpop.f32.mrb[13].mxu0  ;;  %683 = vmatmul.mubr.f32.gmra.mrb[8].mxu1 %v535_v51  ;;  %v537_v61 = vmax.f32 %v431_v48, %v505_v52 }
 0x17a   : > { %v538_v59 = vmax.f32 %v433_v50, %v506_v53  ;;  %v439_v60 = vadd.f32 %v438_v58, %v1630_v55 }
 0x17b   : > { %v507_v62 = vmul.f32 0.01, %v437_v57 }
 0x17c   : > { %v508_v63 = vmul.f32 0.01, %v439_v60  ;;  %v442_v1 = vpop.f32.mrb[14].mxu0  ;;  %687 = vmatprep.mubr.f32.mxu1 %v538_v59 }
 0x17d   : > { %v443_v2 = vadd.f32 %v442_v1, %v1628_v54  ;;  %v444_v3 = vpop.f32.mrb[15].mxu0  ;;  %688 = vmatmul.mubr.f32.gmra.mrb[10].mxu1 %v537_v61  ;;  %v539_v6 = vmax.f32 %v437_v57, %v507_v62 }
 0x17e   : > { %v540_v4 = vmax.f32 %v439_v60, %v508_v63  ;;  %v445_v5 = vadd.f32 %v444_v3, %v1630_v55 }
 0x17f   : > { %v509_v7 = vmul.f32 0.01, %v443_v2 }
 0x180   : > { %v510_v8 = vmul.f32 0.01, %v445_v5  ;;  %v448_v9 = vpop.f32.mrb[16].mxu0  ;;  %692 = vmatprep.mubr.f32.mxu1 %v540_v4 }
 0x181   : > { %v449_v10 = vadd.f32 %v448_v9, %v1628_v54  ;;  %v450_v11 = vpop.f32.mrb[17].mxu0  ;;  %693 = vmatmul.mubr.f32.gmra.mrb[12].mxu1 %v539_v6  ;;  %v541_v14 = vmax.f32 %v443_v2, %v509_v7 }
 0x182   : > { %v542_v12 = vmax.f32 %v445_v5, %v510_v8  ;;  %v451_v13 = vadd.f32 %v450_v11, %v1630_v55 }
 0x183   : > { %v511_v15 = vmul.f32 0.01, %v449_v10 }
 0x184   : > { %v512_v16 = vmul.f32 0.01, %v451_v13  ;;  %v454_v18 = vpop.f32.mrb[18].mxu0  ;;  %697 = vmatprep.mubr.f32.mxu1 %v542_v12 }
 0x185   : > { %v455_v19 = vadd.f32 %v454_v18, %v1628_v54  ;;  %v456_v20 = vpop.f32.mrb[19].mxu0  ;;  %698 = vmatmul.mubr.f32.gmra.mrb[14].mxu1 %v541_v14  ;;  %v543_v38 = vmax.f32 %v449_v10, %v511_v15 }
 0x186   : > { %v544_v21 = vmax.f32 %v451_v13, %v512_v16  ;;  %v457_v23 = vadd.f32 %v456_v20, %v1630_v55 }
 0x187   : > { %v513_v39 = vmul.f32 0.01, %v455_v19 }
 0x188   : > { %v514_v40 = vmul.f32 0.01, %v457_v23  ;;  %v460_v41 = vpop.f32.mrb[20].mxu0  ;;  %702 = vmatprep.mubr.f32.mxu1 %v544_v21 }
 0x189   : > { %v461_v42 = vadd.f32 %v460_v41, %v1628_v54  ;;  %v462_v43 = vpop.f32.mrb[21].mxu0  ;;  %703 = vmatmul.mubr.f32.gmra.mrb[16].mxu1 %v543_v38  ;;  %v545_v46 = vmax.f32 %v455_v19, %v513_v39 }
 0x18a   : > { %v546_v44 = vmax.f32 %v457_v23, %v514_v40  ;;  %v463_v45 = vadd.f32 %v462_v43, %v1630_v55 }
 0x18b   : > { %v515_v47 = vmul.f32 0.01, %v461_v42 }
 0x18c   : > { %v516_v48 = vmul.f32 0.01, %v463_v45  ;;  %v466_v49 = vpop.f32.mrb[22].mxu0  ;;  %707 = vmatprep.mubr.f32.mxu1 %v546_v44 }
 0x18d   : > { %v467_v0 = vadd.f32 %v466_v49, %v1628_v54  ;;  %v468_v50 = vpop.f32.mrb[23].mxu0  ;;  %708 = vmatmul.mubr.f32.gmra.mrb[18].mxu1 %v545_v46  ;;  %v547_v53 = vmax.f32 %v461_v42, %v515_v47 }
 0x18e   : > { %v548_v51 = vmax.f32 %v463_v45, %v516_v48  ;;  %v469_v52 = vadd.f32 %v468_v50, %v1630_v55 }
 0x18f   : > { %v517_v56 = vmul.f32 0.01, %v467_v0 }
 0x190   : > { %v518_v57 = vmul.f32 0.01, %v469_v52  ;;  %v472_v58 = vpop.f32.mrb[24].mxu0  ;;  %712 = vmatprep.mubr.f32.mxu1 %v548_v51 }
 0x191   : > { %v473_v59 = vadd.f32 %v472_v58, %v1628_v54  ;;  %v474_v60 = vpop.f32.mrb[25].mxu0  ;;  %713 = vmatmul.mubr.f32.gmra.mrb[20].mxu1 %v547_v53  ;;  %v549_v63 = vmax.f32 %v467_v0, %v517_v56 }
 0x192   : > { %v550_v61 = vmax.f32 %v469_v52, %v518_v57  ;;  %v475_v62 = vadd.f32 %v474_v60, %v1630_v55 }
 0x193   : > { %v519_v1 = vmul.f32 0.01, %v473_v59 }
 0x194   : > { %v520_v2 = vmul.f32 0.01, %v475_v62  ;;  %v478_v3 = vpop.f32.mrb[26].mxu0  ;;  %717 = vmatprep.mubr.f32.mxu1 %v550_v61 }
 0x195   : > { %v479_v4 = vadd.f32 %v478_v3, %v1628_v54  ;;  %v480_v5 = vpop.f32.mrb[27].mxu0  ;;  %718 = vmatmul.mubr.f32.gmra.mrb[22].mxu1 %v549_v63  ;;  %v551_v8 = vmax.f32 %v473_v59, %v519_v1 }
 0x196   : > { %v552_v6 = vmax.f32 %v475_v62, %v520_v2  ;;  %v481_v7 = vadd.f32 %v480_v5, %v1630_v55 }
 0x197   : > { %v521_v9 = vmul.f32 0.01, %v479_v4 }
 0x198   : > { %v522_v10 = vmul.f32 0.01, %v481_v7  ;;  %v484_v11 = vpop.f32.mrb[28].mxu0  ;;  %722 = vmatprep.mubr.f32.mxu1 %v552_v6 }
 0x199   : > { %v485_v12 = vadd.f32 %v484_v11, %v1628_v54  ;;  %v486_v13 = vpop.f32.mrb[29].mxu0  ;;  %723 = vmatmul.mubr.f32.gmra.mrb[24].mxu1 %v551_v8  ;;  %v553_v16 = vmax.f32 %v479_v4, %v521_v9 }
 0x19a   : > { %v554_v14 = vmax.f32 %v481_v7, %v522_v10  ;;  %v487_v15 = vadd.f32 %v486_v13, %v1630_v55 }
 0x19b   : > { %v523_v18 = vmul.f32 0.01, %v485_v12 }
 0x19c   : > { %v524_v19 = vmul.f32 0.01, %v487_v15  ;;  %v490_v20 = vpop.f32.mrb[30].mxu0  ;;  %727 = vmatprep.mubr.f32.mxu1 %v554_v14 }
 0x19d   : > { %v491_v21 = vadd.f32 %v490_v20, %v1628_v54  ;;  %v492_v23 = vpop.f32.mrb[31].mxu0  ;;  %728 = vmatmul.mubr.f32.gmra.mrb[26].mxu1 %v553_v16  ;;  %v555_v40 = vmax.f32 %v485_v12, %v523_v18  ;;  %v1667_v54 = vld [vmem:[%s1776_s4] ss:$0 sm:$0xff] }
 0x19e   : > { %v556_v38 = vmax.f32 %v487_v15, %v524_v19  ;;  %v493_v39 = vadd.f32 %v492_v23, %v1630_v55 }
 0x19f   : > { %v525_v41 = vmul.f32 0.01, %v491_v21 }
 0x1a0   : > { %v526_v42 = vmul.f32 0.01, %v493_v39  ;;  %732 = vmatprep.mubr.f32.mxu1 %v556_v38 }
 0x1a1   : > { %733 = vmatmul.mubr.f32.gmra.mrb[28].mxu1 %v555_v40  ;;  %v557_v44 = vmax.f32 %v491_v21, %v525_v41 }
 0x1a2   : > { %v558_v43 = vmax.f32 %v493_v39, %v526_v42 }
 0x1a4   : > { %737 = vmatprep.mubr.f32.mxu1 %v558_v43 }
 0x1a5   : > { %738 = vmatmul.mubr.f32.gmra.mrb[30].mxu1 %v557_v44 }
 0x23c   : > { %v966_v45 = vpop.f32.mrb[0].mxu1 }
 0x23d   : > { %v967_v46 = vpop.f32.mrb[1].mxu1 }
 0x23e   : > { %v968_v47 = vadd.f32 %v967_v46, %v966_v45 }
 0x240   : > { %v665_v55 = vadd.f32 %v968_v47, %v1667_v54  ;;  %v969_v48 = vpop.f32.mrb[2].mxu1 }
 0x241   : > { %v970_v49 = vpop.f32.mrb[3].mxu1 }
 0x242   : > { %v743_v0 = vmul.f32 0.01, %v665_v55  ;;  %v971_v50 = vadd.f32 %v970_v49, %v969_v48 }
 0x244   : > { %v759_v51 = vmax.f32 %v665_v55, %v743_v0  ;;  %v670_v52 = vadd.f32 %v971_v50, %v1667_v54  ;;  %v972_v53 = vpop.f32.mrb[4].mxu1 }
 0x245   : > { %v973_v56 = vpop.f32.mrb[5].mxu1 }
 0x246   : > { %v775_v57 = vadd.f32 %v759_v51, %v1547_v17  ;;  %v744_v58 = vmul.f32 0.01, %v670_v52  ;;  %v974_v59 = vadd.f32 %v973_v56, %v972_v53 }
 0x248   : > { %791 = vst [vmem:[%s1674_s10] sm:$0xff] %v775_v57  ;;  %v760_v60 = vmax.f32 %v670_v52, %v744_v58  ;;  %v675_v61 = vadd.f32 %v974_v59, %v1667_v54  ;;  %v975_v62 = vpop.f32.mrb[6].mxu1 }
 0x249   : > { %v976_v63 = vpop.f32.mrb[7].mxu1 }
 0x24a   : > { %v776_v1 = vadd.f32 %v760_v60, %v1552_v22  ;;  %v745_v2 = vmul.f32 0.01, %v675_v61  ;;  %v977_v3 = vadd.f32 %v976_v63, %v975_v62 }
 0x24c   : > { %792 = vst [vmem:[%s1674_s10 + $0x8] sm:$0xff] %v776_v1  ;;  %v761_v17 = vmax.f32 %v675_v61, %v745_v2  ;;  %v680_v4 = vadd.f32 %v977_v3, %v1667_v54  ;;  %v978_v5 = vpop.f32.mrb[8].mxu1 }
 0x24d   : > { %v979_v6 = vpop.f32.mrb[9].mxu1 }
 0x24e   : > { %v777_v7 = vadd.f32 %v761_v17, %v1557_v24  ;;  %v746_v8 = vmul.f32 0.01, %v680_v4  ;;  %v980_v9 = vadd.f32 %v979_v6, %v978_v5 }
 0x250   : > { %793 = vst [vmem:[%s1674_s10 + $0x10] sm:$0xff] %v777_v7  ;;  %v762_v10 = vmax.f32 %v680_v4, %v746_v8  ;;  %v685_v11 = vadd.f32 %v980_v9, %v1667_v54  ;;  %v981_v12 = vpop.f32.mrb[10].mxu1 }
 0x251   : > { %v982_v22 = vpop.f32.mrb[11].mxu1 }
 0x252   : > { %v778_v13 = vadd.f32 %v762_v10, %v1562_v25  ;;  %v747_v14 = vmul.f32 0.01, %v685_v11  ;;  %v983_v15 = vadd.f32 %v982_v22, %v981_v12 }
 0x254   : > { %794 = vst [vmem:[%s1674_s10 + $0x18] sm:$0xff] %v778_v13  ;;  %v763_v16 = vmax.f32 %v685_v11, %v747_v14  ;;  %v690_v18 = vadd.f32 %v983_v15, %v1667_v54  ;;  %v984_v19 = vpop.f32.mrb[12].mxu1 }
 0x255   : > { %v985_v24 = vpop.f32.mrb[13].mxu1 }
 0x256   : > { %v779_v20 = vadd.f32 %v763_v16, %v1567_v26  ;;  %v748_v21 = vmul.f32 0.01, %v690_v18  ;;  %v986_v23 = vadd.f32 %v985_v24, %v984_v19 }
 0x258   : > { %795 = vst [vmem:[%s1674_s10 + $0x20] sm:$0xff] %v779_v20  ;;  %v764_v38 = vmax.f32 %v690_v18, %v748_v21  ;;  %v695_v39 = vadd.f32 %v986_v23, %v1667_v54  ;;  %v987_v40 = vpop.f32.mrb[14].mxu1 }
 0x259   : > { %v988_v25 = vpop.f32.mrb[15].mxu1 }
 0x25a   : > { %v780_v41 = vadd.f32 %v764_v38, %v1572_v27  ;;  %v749_v42 = vmul.f32 0.01, %v695_v39  ;;  %v989_v43 = vadd.f32 %v988_v25, %v987_v40 }
 0x25c   : > { %796 = vst [vmem:[%s1674_s10 + $0x28] sm:$0xff] %v780_v41  ;;  %v765_v44 = vmax.f32 %v695_v39, %v749_v42  ;;  %v700_v45 = vadd.f32 %v989_v43, %v1667_v54  ;;  %v990_v46 = vpop.f32.mrb[16].mxu1 }
 0x25d   : > { %v991_v26 = vpop.f32.mrb[17].mxu1 }
 0x25e   : > { %v781_v47 = vadd.f32 %v765_v44, %v1577_v28  ;;  %v750_v55 = vmul.f32 0.01, %v700_v45  ;;  %v992_v48 = vadd.f32 %v991_v26, %v990_v46 }
 0x260   : > { %797 = vst [vmem:[%s1674_s10 + $0x30] sm:$0xff] %v781_v47  ;;  %v766_v49 = vmax.f32 %v700_v45, %v750_v55  ;;  %v705_v0 = vadd.f32 %v992_v48, %v1667_v54  ;;  %v993_v50 = vpop.f32.mrb[18].mxu1 }
 0x261   : > { %v994_v27 = vpop.f32.mrb[19].mxu1 }
 0x262   : > { %v782_v51 = vadd.f32 %v766_v49, %v1582_v29  ;;  %v751_v52 = vmul.f32 0.01, %v705_v0  ;;  %v995_v53 = vadd.f32 %v994_v27, %v993_v50 }
 0x264   : > { %798 = vst [vmem:[%s1674_s10 + $0x38] sm:$0xff] %v782_v51  ;;  %v767_v56 = vmax.f32 %v705_v0, %v751_v52  ;;  %v710_v57 = vadd.f32 %v995_v53, %v1667_v54  ;;  %v996_v58 = vpop.f32.mrb[20].mxu1 }
 0x265   : > { %v997_v28 = vpop.f32.mrb[21].mxu1 }
 0x266   : > { %v783_v59 = vadd.f32 %v767_v56, %v1587_v30  ;;  %v752_v60 = vmul.f32 0.01, %v710_v57  ;;  %v998_v61 = vadd.f32 %v997_v28, %v996_v58 }
 0x268   : > { %799 = vst [vmem:[%s1674_s10 + $0x40] sm:$0xff] %v783_v59  ;;  %v768_v62 = vmax.f32 %v710_v57, %v752_v60  ;;  %v715_v63 = vadd.f32 %v998_v61, %v1667_v54  ;;  %v999_v1 = vpop.f32.mrb[22].mxu1 }
 0x269   : > { %v1000_v29 = vpop.f32.mrb[23].mxu1 }
 0x26a   : > { %v784_v2 = vadd.f32 %v768_v62, %v1592_v31  ;;  %v753_v3 = vmul.f32 0.01, %v715_v63  ;;  %v1001_v17 = vadd.f32 %v1000_v29, %v999_v1 }
 0x26c   : > { %800 = vst [vmem:[%s1674_s10 + $0x48] sm:$0xff] %v784_v2  ;;  %v769_v4 = vmax.f32 %v715_v63, %v753_v3  ;;  %v720_v5 = vadd.f32 %v1001_v17, %v1667_v54  ;;  %v1002_v6 = vpop.f32.mrb[24].mxu1 }
 0x26d   : > { %v1003_v30 = vpop.f32.mrb[25].mxu1 }
 0x26e   : > { %v785_v7 = vadd.f32 %v769_v4, %v1597_v32  ;;  %v754_v8 = vmul.f32 0.01, %v720_v5  ;;  %v1004_v9 = vadd.f32 %v1003_v30, %v1002_v6 }
 0x270   : > { %801 = vst [vmem:[%s1674_s10 + $0x50] sm:$0xff] %v785_v7  ;;  %v770_v10 = vmax.f32 %v720_v5, %v754_v8  ;;  %v725_v11 = vadd.f32 %v1004_v9, %v1667_v54  ;;  %v1005_v12 = vpop.f32.mrb[26].mxu1 }
 0x271   : > { %v1006_v31 = vpop.f32.mrb[27].mxu1 }
 0x272   : > { %v786_v22 = vadd.f32 %v770_v10, %v1602_v33  ;;  %v755_v13 = vmul.f32 0.01, %v725_v11  ;;  %v1007_v14 = vadd.f32 %v1006_v31, %v1005_v12 }
 0x274   : > { %802 = vst [vmem:[%s1674_s10 + $0x58] sm:$0xff] %v786_v22  ;;  %v771_v15 = vmax.f32 %v725_v11, %v755_v13  ;;  %v730_v16 = vadd.f32 %v1007_v14, %v1667_v54  ;;  %v1008_v18 = vpop.f32.mrb[28].mxu1 }
 0x275   : > { %v1009_v32 = vpop.f32.mrb[29].mxu1 }
 0x276   : > { %v787_v19 = vadd.f32 %v771_v15, %v1607_v34  ;;  %v756_v24 = vmul.f32 0.01, %v730_v16  ;;  %v1010_v20 = vadd.f32 %v1009_v32, %v1008_v18 }
 0x278   : > { %803 = vst [vmem:[%s1674_s10 + $0x60] sm:$0xff] %v787_v19  ;;  %v772_v21 = vmax.f32 %v730_v16, %v756_v24  ;;  %v735_v33 = vadd.f32 %v1010_v20, %v1667_v54  ;;  %v1011_v23 = vpop.f32.mrb[30].mxu1 }
 0x279   : > { %v1012_v38 = vpop.f32.mrb[31].mxu1 }
 0x27a   : > { %v788_v39 = vadd.f32 %v772_v21, %v1612_v35  ;;  %v757_v40 = vmul.f32 0.01, %v735_v33  ;;  %v1013_v25 = vadd.f32 %v1012_v38, %v1011_v23 }
 0x27c   : > { %804 = vst [vmem:[%s1674_s10 + $0x68] sm:$0xff] %v788_v39  ;;  %v773_v34 = vmax.f32 %v735_v33, %v757_v40  ;;  %v740_v41 = vadd.f32 %v1013_v25, %v1667_v54 }
 0x27e   : > { %v789_v42 = vadd.f32 %v773_v34, %v1617_v36  ;;  %v758_v43 = vmul.f32 0.01, %v740_v41 }
 0x280   : > { %805 = vst [vmem:[%s1674_s10 + $0x70] sm:$0xff] %v789_v42  ;;  %v774_v44 = vmax.f32 %v740_v41, %v758_v43 }
 0x282   : > { %v790_v35 = vadd.f32 %v774_v44, %v1622_v37 }
 0x284   : > { %806 = vst [vmem:[%s1674_s10 + $0x78] sm:$0xff] %v790_v35 }
 0x285   : > { %1251 = shalt.err (!%p1248_p2)
}
 0x286   : > { %s1252_s14 = scalar_lea.hbm %s1724_s11, 2048  ;;  %s1256_s12 = scalar_lea.hbm %s1777_s5, 4096 }
 0x287   : > { %p1253_p13 = scmp.ne.s32.totalorder %s1724_s11, %s1252_s14  ;;  %p1257_p4 = scmp.lt.u32.totalorder %s1724_s11, %s1777_s5 }
 0x288   : > { %p1258_p7 = scmp.lt.u32.totalorder %s1256_s12, %s1252_s14  ;;  %p1260_p11 = scmp.lt.u32.totalorder %s1252_s14, %s1724_s11 }
 0x289   : > { %p1254_p6 = pnand %p1253_p13, %p1791_p0 }
 0x28a   : > { %p1259_p8 = por %p1258_p7, %p1257_p4 }
 0x28b   : > { %p1255_p10 = pneg %p1254_p6 }
 0x28c   : > { %p1261_p1 = por %p1260_p11, %p1259_p8 }
 0x28e   : > { %p1262_p3 = pnand %p1261_p1, %p1255_p10 }
 0x290   : > { %1265 = shalt.err (!%p1262_p3)
}
 0x291   : > { %s1319_s28 = smov 128   ;;  %s1320_s9 = smov 8  }
 0x292   : > { %1088 = dma.vmem_to_hbm [thread:$0]  (%p1791_p0), %s1726_s15, 2048, %s1724_s11, %s808_s23, %s1319_s28, %s1319_s28, %s1320_s9  }
 0x293 PF: > { %s836_s30 = sand.u32 1, %s1296_s18   ;;  %p1792_p5 = scmp.ne.s32.totalorder %s1782_s25, 0 }
 0x294   : > { %p1793_p9 = scmp.ge.s32.totalorder %s1308_s21, 2  ;;  %s837_s7 = scalar_lea.sflag [#allocation4], %s836_s30 }
 0x296   : > { %p1102_p12 = pnand %p1793_p9, %p1792_p5 }
 0x298   : > { %1291 = dma.done.wait (!%p1102_p12), %s837_s7, 2048  }
 0x299   : > { %1293 = vsyncadd (!%p1102_p12), %s837_s7, 4294965248  ;;  %p19_p2 = scmp.ge.s32.totalorder %s1464_s16, 4   ;;  %s1794_s18 = smov %s1300_s19 }
 0x29a   : > { %s1795_s19 = smov %s1304_s20  ;;  %s1796_s20 = smov %s1473_s27 }
 0x29b   : > { %s1797_s21 = smov %s1464_s16  ;;  %21 = sbr.rel (!%p19_p2) target bundleno = 6 (0x6), region = 93 }
 0x2a2   :  { %842 = vsyncpa [#allocation3], 1 }
 0x2a3   :  { %844 = vsyncpa [#allocation3 + $0x1], 1 }
 0x2a4   :  { %845 = vsyncpa [#allocation6], 1 }
 0x2a5   :  { %846 = vsyncpa [#allocation4], 1 }
 0x2a6   :  { %848 = vsyncpa [#allocation4 + $0x1], 1 }

// kernel: tpu_custom_call.1
= control target key start
LH: loop header
LB: loop body
LE: loop exit
PB: predicated region body
PF: predicated region fallthrough
CT: control target
= control target key end

     0   :  { %10 = vsyncpa [#allocation3], 0  ;;  %s1772_s0 = inlined_call_operand.hbm [shape: f32[256,128], index: 0, kind: input, shape index: {}]   ;;  %s1773_s1 = inlined_call_operand.hbm [shape: f32[128,256], index: 1, kind: input, shape index: {}]   ;;  %s1774_s2 = inlined_call_operand.vmem [shape: f32[1,256], index: 2, kind: input, shape index: {}]   ;;  %s1775_s3 = inlined_call_operand.hbm [shape: f32[256,128], index: 3, kind: input, shape index: {}]   ;;  %s1776_s4 = inlined_call_operand.vmem [shape: f32[1,128], index: 4, kind: input, shape index: {}]   ;;  %s1777_s5 = inlined_call_operand.hbm [shape: f32[256,128], index: 5, kind: output, shape index: {}]  }
   0x1   :  { %12 = vsyncpa [#allocation3 + $0x1], 0 }
   0x2   :  { %13 = vsyncpa [#allocation6], 0 }
   0x3   :  { %14 = vsyncpa [#allocation4], 0 }
   0x4   :  { %16 = vsyncpa [#allocation4 + $0x1], 0  ;;  %s1351_s18 = smov 0   ;;  %s1353_s19 = smov 0  }
   0x5   :  { %s1355_s20 = smov 0   ;;  %s1357_s21 = smov 0  }
   0x6 LB: > { %s1372_s22 = sadd.s32 4294967295, %s1308_s21   ;;  %s913_s23 = sadd.s32 4294967294, %s1308_s21   ;;  %s1308_s21 = sphi %s1357_s21, %s1797_s21   ;;  %s1304_s20 = sphi %s1355_s20, %s1796_s20   ;;  %s1300_s19 = sphi %s1353_s19, %s1795_s19   ;;  %s1296_s18 = sphi %s1351_s18, %s1794_s18  }
   0x7   : > { %p42_p0 = scmp.ne.s32.totalorder %s1300_s19, %s1296_s18  ;;  %p1778_p1 = scmp.eq.s32.totalorder %s1372_s22, 0 }
   0x8   : > { %p156_p3 = scmp.eq.s32.totalorder %s913_s23, 1  ;;  %p914_p5 = scmp.ge.s32.totalorder %s1308_s21, 1 }
   0x9   : > { %p1381_p4 = por %p1778_p1, %p42_p0  ;;  %p163_p7 = scmp.lt.s32.totalorder %s1308_s21, 3 }
   0xa   : > { %p1386_p6 = por %p156_p3, %p42_p0  ;;  %s1310_s27 = smov [#allocation5]  }
   0xb   : > { %s1781_s24 = scalar_select %p1381_p4, 1, 0 }
   0xc   : > { %s1782_s25 = scalar_select %p1386_p6, 1, 0 }
   0xd   : > { %p1391_p8 = pnand %p914_p5, %p163_p7  ;;  %s175_s28 = sshll.u32 %s1310_s27, 4  ;;  %s1395_s28 = int_to_ptr.vmem [resolvable:$true] %s175_s28 }
   0xe   : > { %s1311_s30 = smov [#allocation7]   ;;  %s1152_s9 = scalar_lea.hbm %s1773_s1, 4096 }
   0xf   : > { %p1090_p9 = pneg %p1391_p8  ;;  %s191_s6 = sshll.u32 %s1311_s30, 4  ;;  %s1406_s6 = int_to_ptr.vmem [resolvable:$true] %s191_s6 }
  0x10   : > { %p1153_p12 = scmp.ne.s32.totalorder %s1773_s1, %s1152_s9  ;;  %p1159_p5 = scmp.lt.u32.totalorder %s1152_s9, %s1773_s1 }
  0x11   : > { %p1402_p11 = pnand %p1090_p9, %p1778_p1 }
  0x13   : > { %p1154_p13 = pneg %p1402_p11 }
  0x15   : > { %p1155_p0 = pnand %p1154_p13, %p1153_p12 }
  0x17   : > { %p1156_p3 = pneg %p1155_p0 }
  0x19   : > { %p1161_p7 = pnand %p1159_p5, %p1156_p3 }
  0x1b   : > { %1164 = shalt.err (!%p1161_p7)
}
  0x1c   : > { %s1165_s14 = scalar_lea.vmem %s1395_s28, 4096  ;;  %p1173_p2 = scmp.lt.s32.totalorder %s1395_s28, %s1395_s28 }
  0x1d   : > { %p1166_p9 = scmp.ne.s32.totalorder %s1395_s28, %s1165_s14  ;;  %p1174_p12 = scmp.lt.s32.totalorder %s1165_s14, %s1165_s14 }
  0x1f   : > { %p1168_p10 = pnand %p1166_p9, %p1154_p13  ;;  %p1175_p0 = por %p1174_p12, %p1173_p2 }
  0x21   : > { %p1169_p1 = pneg %p1168_p10 }
  0x23   : > { %p1176_p6 = pnand %p1175_p0, %p1169_p1 }
  0x25   : > { %1179 = shalt.err (!%p1176_p6)
}
  0x26   : > { %s1312_s15 = smov 256   ;;  %s1313_s16 = smov 16  }
  0x27   : > { %1093 = dma.hbm_to_vmem [thread:$0]  (!%p1402_p11), %s1773_s1, 4096, %s1395_s28, [#allocation6], %s1312_s15, %s1312_s15, %s1313_s16  }
  0x28   : > { %s1180_s7 = scalar_lea.hbm %s1775_s3, 4096 }
  0x29   : > { %p1181_p2 = scmp.ne.s32.totalorder %s1775_s3, %s1180_s7  ;;  %p1187_p10 = scmp.lt.u32.totalorder %s1180_s7, %s1775_s3 }
  0x2b   : > { %p1183_p1 = pnand %p1181_p2, %p1154_p13 }
  0x2d   : > { %p1184_p6 = pneg %p1183_p1 }
  0x2f   : > { %p1189_p3 = pnand %p1187_p10, %p1184_p6 }
  0x31   : > { %1192 = shalt.err (!%p1189_p3)
}
  0x32   : > { %s1193_s28 = scalar_lea.vmem %s1406_s6, 4096  ;;  %p1201_p12 = scmp.lt.s32.totalorder %s1406_s6, %s1406_s6 }
  0x33   : > { %p1194_p5 = scmp.ne.s32.totalorder %s1406_s6, %s1193_s28  ;;  %p1202_p0 = scmp.lt.s32.totalorder %s1193_s28, %s1193_s28 }
  0x35   : > { %p1196_p7 = pnand %p1194_p5, %p1154_p13  ;;  %p1203_p2 = por %p1202_p0, %p1201_p12 }
  0x37   : > { %p1197_p9 = pneg %p1196_p7 }
  0x39   : > { %p1204_p1 = pnand %p1203_p2, %p1197_p9 }
  0x3b   : > { %1207 = shalt.err (!%p1204_p1)
}
  0x3c   : > { %s1314_s12 = smov 128   ;;  %s1315_s13 = smov 8  }
  0x3d   : > { %1096 = dma.hbm_to_vmem [thread:$0]  (!%p1402_p11), %s1775_s3, 4096, %s1406_s6, [#allocation6], %s1314_s12, %s1314_s12, %s1315_s13  }
  0x3e   : > { %s1464_s16 = sadd.s32 1, %s1308_s21   ;;  %s29_s23 = sadd.s32 1, %s1304_s20 }
  0x3f   : > { %s26_s17 = ssub.s32 %s1308_s21, %s1464_s16  ;;  %p36_p6 = scmp.ne.s32.totalorder %s1304_s20, %s1300_s19 }
  0x40   : > { %p27_p13 = scmp.eq.s32.totalorder %s26_s17, 0  ;;  %p37_p10 = scmp.eq.s32.totalorder %s1308_s21, 0 }
  0x41   : > { %p1785_p5 = scmp.eq.s32.totalorder %s1372_s22, 1  ;;  %p1107_p9 = scmp.lt.s32.totalorder %s1308_s21, 2 }
  0x42   : > { %s1473_s27 = scalar_select %p27_p13, %s1304_s20, %s29_s23  }
  0x43   : > { %p38_p3 = por %p37_p10, %p36_p6  ;;  %p1477_p7 = por %p1785_p5, %p36_p6 }
  0x44   : > { %s208_s30 = sand.u32 1, %s1304_s20   ;;  %s932_s6 = sshll.u32 %s1308_s21, 11 }
  0x45   : > { %s1786_s29 = scalar_select %p1477_p7, 1, 0 }
  0x46   : > { %s918_s7 = sshll.u32 %s208_s30, 7  ;;  %s1487_s10 = scalar_lea.hbm %s1772_s0, %s932_s6 }
  0x47   : > { %s212_s11 = scalar_lea.vmem [#allocation2], %s918_s7  ;;  %p1491_p11 = pnand %p1107_p9, %p38_p3 }
  0x48   : > { %s219_s28 = sshll.u32 %s212_s11, 4  ;;  %s1495_s15 = scalar_lea.sflag [#allocation3], %s208_s30  ;;  %s1489_s28 = int_to_ptr.vmem [resolvable:$true] %s219_s28 }
  0x49   : > { %s1208_s17 = scalar_lea.hbm %s1487_s10, 2048  ;;  %p1210_p0 = pneg %p1491_p11 }
  0x4a   : > { %p1209_p12 = scmp.ne.s32.totalorder %s1487_s10, %s1208_s17  ;;  %s1213_s6 = scalar_lea.hbm %s1772_s0, 4096 }
  0x4b   : > { %p1214_p13 = scmp.lt.u32.totalorder %s1487_s10, %s1772_s0  ;;  %p1215_p6 = scmp.lt.u32.totalorder %s1213_s6, %s1208_s17 }
  0x4c   : > { %p1211_p2 = pnand %p1210_p0, %p1209_p12  ;;  %p1217_p3 = scmp.lt.u32.totalorder %s1208_s17, %s1487_s10 }
  0x4d   : > { %p1216_p10 = por %p1215_p6, %p1214_p13 }
  0x4e   : > { %p1212_p1 = pneg %p1211_p2 }
  0x4f   : > { %p1218_p5 = por %p1217_p3, %p1216_p10 }
  0x51   : > { %p1219_p9 = pnand %p1218_p5, %p1212_p1 }
  0x53   : > { %1222 = shalt.err (!%p1219_p9)
}
  0x54   : > { %s1223_s30 = scalar_lea.vmem %s1489_s28, 2048  ;;  %s1316_s11 = smov [#allocation2]  }
  0x55   : > { %p1224_p12 = scmp.ne.s32.totalorder %s1489_s28, %s1223_s30  ;;  %s1228_s23 = sshll.u32 %s1316_s11, 4  ;;  %s1229_s23 = int_to_ptr.vmem [resolvable:$false] %s1228_s23 }
  0x56   : > { %s1230_s7 = scalar_lea.vmem %s1229_s23, 4096  ;;  %p1231_p4 = scmp.lt.s32.totalorder %s1489_s28, %s1229_s23 }
  0x57   : > { %p1226_p2 = pnand %p1224_p12, %p1210_p0  ;;  %p1232_p13 = scmp.lt.s32.totalorder %s1230_s7, %s1223_s30 }
  0x59   : > { %p1227_p7 = pneg %p1226_p2  ;;  %p1233_p6 = por %p1232_p13, %p1231_p4 }
  0x5b   : > { %p1234_p10 = pnand %p1233_p6, %p1227_p7 }
  0x5d   : > { %1237 = shalt.err (!%p1234_p10)
}
  0x5e   : > { %1100 = dma.hbm_to_vmem [thread:$0]  (!%p1491_p11), %s1487_s10, 2048, %s1489_s28, %s1495_s15, %s1314_s12, %s1314_s12, %s1315_s13  }
  0x5f   : > { %231 = sbr.rel (%p1391_p8) target bundleno = 659 (0x293), region = 40  ;;  %s1529_s17 = sand.u32 (!%p1391_p8), 1, %s1300_s19  }
  0x60   : > { %s922_s6 = sshll.u32 (!%p1391_p8), %s1529_s17, 7  ;;  %s234_s8 = scalar_lea.sflag (!%p1391_p8), [#allocation3], %s1529_s17 }
  0x61   : > { %s1535_s14 = scalar_lea.vmem (!%p1391_p8), [#allocation2], %s922_s6  ;;  %p1788_p4 = scmp.ne.s32.totalorder (!%p1391_p8), %s1781_s24, 0 }
  0x66   : > { %1283 = dma.done.wait (%p1788_p4), %s234_s8, 2048  }
  0x67   : > { %1285 = vsyncadd (%p1788_p4), %s234_s8, 4294965248  ;;  %p1789_p7 = scmp.eq.s32.totalorder %s1372_s22, 0 }
  0x69   : > { %1287 = dma.done.wait (%p1789_p7), [#allocation6], 8192   ;;  %p1790_p8 = pmov %p1789_p7 }
  0x6a   : > { %v1317_v0 = vmov 0.0   ;;  %v291_v1 = vld [vmem:[#allocation5 + $0x8] sm:$0xff]  ;;  %v293_v2 = vld [vmem:[#allocation5 + $0x18] sm:$0xff]  ;;  %v290_v3 = vld [vmem:[#allocation5] sm:$0xff]  ;;  %s1674_s10 = scalar_lea.vmem [#allocation8], %s922_s6  ;;  %s933_s28 = sshll.u32 %s1372_s22, 11 }
  0x6b   : > { %1289 = vsyncadd (%p1790_p8), [#allocation6], 4294959104  ;;  %398 = vmatprep.mubr.f32.mxu0 %v1317_v0  ;;  %v1014_v4 = vpack.c.bf16 %v293_v2, %v291_v1  ;;  %v292_v5 = vld [vmem:[#allocation5 + $0x10] sm:$0xff]  ;;  %v295_v6 = vld [vmem:[#allocation5 + $0x28] sm:$0xff]  ;;  %s821_s15 = sshll.u32 %s1674_s10, 4  ;;  %s1724_s11 = scalar_lea.hbm %s1777_s5, %s933_s28  ;;  %s1726_s15 = int_to_ptr.vmem [resolvable:$true] %s821_s15 }
  0x6c   : > { %v297_v7 = vld [vmem:[#allocation5 + $0x38] sm:$0xff]  ;;  %v1016_v8 = vpack.c.bf16 %v292_v5, %v290_v3  ;;  %v294_v10 = vld [vmem:[#allocation5 + $0x20] sm:$0xff]  ;;  %v296_v11 = vld [vmem:[#allocation5 + $0x30] sm:$0xff]  ;;  %s808_s23 = scalar_lea.sflag [#allocation4], %s1529_s17  ;;  %s1238_s7 = scalar_lea.vmem %s1726_s15, 2048 }
  0x6d   : > { %v1018_v9 = vpack.c.bf16 %v297_v7, %v295_v6  ;;  %v299_v12 = vld [vmem:[#allocation5 + $0x48] sm:$0xff]  ;;  %1015 = vmatprep.subr.bf16.mxu0 %v1014_v4  ;;  %v301_v13 = vld [vmem:[#allocation5 + $0x58] sm:$0xff]  ;;  %v1020_v14 = vpack.c.bf16 %v296_v11, %v294_v10  ;;  %v298_v16 = vld [vmem:[#allocation5 + $0x40] sm:$0xff]  ;;  %p1239_p11 = scmp.ne.s32.totalorder %s1726_s15, %s1238_s7  ;;  %p1791_p0 = scmp.ne.s32.totalorder %s1786_s29, 0 }
  0x6e   : > { %1017 = vmatpush1.bf16.msra.mxu0 %v1016_v8  ;;  %v1022_v15 = vpack.c.bf16 %v301_v13, %v299_v12  ;;  %v300_v17 = vld [vmem:[#allocation5 + $0x50] sm:$0xff]  ;;  %v303_v18 = vld [vmem:[#allocation5 + $0x68] sm:$0xff]  ;;  %v305_v19 = vld [vmem:[#allocation5 + $0x78] sm:$0xff]  ;;  %s1318_s22 = smov [#allocation8]  }
  0x6f   : > { %1019 = vmatprep.subr.bf16.mxu0 %v1018_v9  ;;  %v1024_v20 = vpack.c.bf16 %v300_v17, %v298_v16  ;;  %v1026_v21 = vpack.c.bf16 %v305_v19, %v303_v18  ;;  %v302_v22 = vld [vmem:[#allocation5 + $0x60] sm:$0xff]  ;;  %v304_v23 = vld [vmem:[#allocation5 + $0x70] sm:$0xff]  ;;  %v307_v24 = vld [vmem:[#allocation5 + $0x88] sm:$0xff]  ;;  %p1240_p1 = pnand %p1239_p11, %p1791_p0  ;;  %s1242_s6 = sshll.u32 %s1318_s22, 4  ;;  %s1243_s6 = int_to_ptr.vmem [resolvable:$false] %s1242_s6 }
  0x70   : > { %v309_v25 = vld [vmem:[#allocation5 + $0x98] sm:$0xff]  ;;  %v1028_v26 = vpack.c.bf16 %v304_v23, %v302_v22  ;;  %v306_v28 = vld [vmem:[#allocation5 + $0x80] sm:$0xff]  ;;  %v308_v29 = vld [vmem:[#allocation5 + $0x90] sm:$0xff]  ;;  %s1244_s8 = scalar_lea.vmem %s1243_s6, 4096  ;;  %p1245_p5 = scmp.lt.s32.totalorder %s1726_s15, %s1243_s6 }
  0x71   : > { %v1030_v27 = vpack.c.bf16 %v309_v25, %v307_v24  ;;  %v311_v30 = vld [vmem:[#allocation5 + $0xa8] sm:$0xff]  ;;  %v313_v31 = vld [vmem:[#allocation5 + $0xb8] sm:$0xff]  ;;  %v310_v32 = vld [vmem:[#allocation5 + $0xa0] sm:$0xff]  ;;  %v1032_v34 = vpack.c.bf16 %v308_v29, %v306_v28  ;;  %p1241_p3 = pneg %p1240_p1  ;;  %p1246_p9 = scmp.lt.s32.totalorder %s1244_s8, %s1238_s7 }
  0x72   : > { %1021 = vmatpush1.bf16.msra.mxu0 %v1020_v14  ;;  %v312_v33 = vld [vmem:[#allocation5 + $0xb0] sm:$0xff]  ;;  %v315_v35 = vld [vmem:[#allocation5 + $0xc8] sm:$0xff]  ;;  %v317_v36 = vld [vmem:[#allocation5 + $0xd8] sm:$0xff]  ;;  %v1034_v40 = vpack.c.bf16 %v313_v31, %v311_v30 }
  0x73   : > { %1023 = vmatprep.subr.bf16.mxu0 %v1022_v15  ;;  %v575_v37 = vld [vmem:[#allocation7 + $0x80] sm:$0xff]  ;;  %v576_v38 = vld [vmem:[#allocation7 + $0x88] sm:$0xff]  ;;  %v577_v43 = vld [vmem:[#allocation7 + $0x90] sm:$0xff]  ;;  %v1036_v51 = vpack.c.bf16 %v312_v33, %v310_v32  ;;  %v1038_v55 = vpack.c.bf16 %v317_v36, %v315_v35  ;;  %p1247_p12 = por %p1246_p9, %p1245_p5 }
  0x74   : > { %v559_v39 = vld [vmem:[#allocation7] sm:$0xff]  ;;  %v1046_v41 = vpack.c.bf16 %v576_v38, %v575_v37  ;;  %v560_v42 = vld [vmem:[#allocation7 + $0x8] sm:$0xff]  ;;  %v578_v44 = vld [vmem:[#allocation7 + $0x98] sm:$0xff] }
  0x75   : > { %v1048_v45 = vpack.c.bf16 %v560_v42, %v559_v39  ;;  %v1050_v46 = vpack.c.bf16 %v578_v44, %v577_v43  ;;  %v561_v47 = vld [vmem:[#allocation7 + $0x10] sm:$0xff]  ;;  %v562_v48 = vld [vmem:[#allocation7 + $0x18] sm:$0xff]  ;;  %v579_v49 = vld [vmem:[#allocation7 + $0xa0] sm:$0xff]  ;;  %p1248_p2 = pnand %p1247_p12, %p1241_p3 }
  0x76   : > { %1025 = vmatpush1.bf16.msra.mxu0 %v1024_v20  ;;  %1047 = vmatprep.subr.bf16.mxu1 %v1046_v41  ;;  %v580_v50 = vld [vmem:[#allocation7 + $0xa8] sm:$0xff]  ;;  %v314_v52 = vld [vmem:[#allocation5 + $0xc0] sm:$0xff]  ;;  %v316_v53 = vld [vmem:[#allocation5 + $0xd0] sm:$0xff]  ;;  %v1052_v54 = vpack.c.bf16 %v562_v48, %v561_v47 }
  0x77   : > { %1027 = vmatprep.subr.bf16.mxu0 %v1026_v21  ;;  %1049 = vmatpush3.bf16.msra.mxu1 %v1048_v45  ;;  %v319_v56 = vld [vmem:[#allocation5 + $0xe8] sm:$0xff]  ;;  %v1054_v57 = vpack.c.bf16 %v580_v50, %v579_v49  ;;  %v563_v58 = vld [vmem:[#allocation7 + $0x20] sm:$0xff]  ;;  %v321_v60 = vld [vmem:[#allocation5 + $0xf8] sm:$0xff]  ;;  %v1040_v63 = vpack.c.bf16 %v316_v53, %v314_v52 }
  0x78   : > { %1051 = vmatprep.subr.bf16.mxu1 %v1050_v46  ;;  %v564_v59 = vld [vmem:[#allocation7 + $0x28] sm:$0xff]  ;;  %v581_v61 = vld [vmem:[#allocation7 + $0xb0] sm:$0xff]  ;;  %v582_v62 = vld [vmem:[#allocation7 + $0xb8] sm:$0xff]  ;;  %v1042_v3 = vpack.c.bf16 %v321_v60, %v319_v56 }
  0x79   : > { %v318_v1 = vld [vmem:[#allocation5 + $0xe0] sm:$0xff]  ;;  %v1056_v2 = vpack.c.bf16 %v564_v59, %v563_v58  ;;  %v320_v4 = vld [vmem:[#allocation5 + $0xf0] sm:$0xff]  ;;  %v1058_v5 = vpack.c.bf16 %v582_v62, %v581_v61  ;;  %v566_v7 = vld [vmem:[#allocation7 + $0x38] sm:$0xff] }
  0x7a   : > { %1029 = vmatpush1.bf16.msra.mxu0 %v1028_v26  ;;  %v565_v6 = vld [vmem:[#allocation7 + $0x30] sm:$0xff]  ;;  %v583_v8 = vld [vmem:[#allocation7 + $0xc0] sm:$0xff]  ;;  %v584_v9 = vld [vmem:[#allocation7 + $0xc8] sm:$0xff]  ;;  %v1044_v10 = vpack.c.bf16 %v320_v4, %v318_v1 }
  0x7b   : > { %1031 = vmatprep.subr.bf16.mxu0 %v1030_v27  ;;  %1053 = vmatpush3.bf16.msra.mxu1 %v1052_v54  ;;  %v1060_v11 = vpack.c.bf16 %v566_v7, %v565_v6  ;;  %v1062_v12 = vpack.c.bf16 %v584_v9, %v583_v8  ;;  %v567_v13 = vld [vmem:[#allocation7 + $0x40] sm:$0xff]  ;;  %v568_v14 = vld [vmem:[#allocation7 + $0x48] sm:$0xff]  ;;  %v585_v15 = vld [vmem:[#allocation7 + $0xd0] sm:$0xff] }
  0x7c   : > { %1055 = vmatprep.subr.bf16.mxu1 %v1054_v57  ;;  %v586_v16 = vld [vmem:[#allocation7 + $0xd8] sm:$0xff]  ;;  %v1547_v17 = vld [vmem:[%s1535_s14] sm:$0xff]  ;;  %v1064_v18 = vpack.c.bf16 %v568_v14, %v567_v13  ;;  %v569_v20 = vld [vmem:[#allocation7 + $0x50] sm:$0xff] }
  0x7d   : > { %v1066_v19 = vpack.c.bf16 %v586_v16, %v585_v15  ;;  %v570_v21 = vld [vmem:[#allocation7 + $0x58] sm:$0xff]  ;;  %v1552_v22 = vld [vmem:[%s1535_s14 + $0x8] sm:$0xff]  ;;  %v1557_v24 = vld [vmem:[%s1535_s14 + $0x10] sm:$0xff] }
  0x7e   : > { %1033 = vmatpush1.bf16.msra.mxu0 %v1032_v34  ;;  %v1068_v23 = vpack.c.bf16 %v570_v21, %v569_v20  ;;  %v1562_v25 = vld [vmem:[%s1535_s14 + $0x18] sm:$0xff]  ;;  %v1567_v26 = vld [vmem:[%s1535_s14 + $0x20] sm:$0xff]  ;;  %v1572_v27 = vld [vmem:[%s1535_s14 + $0x28] sm:$0xff] }
  0x7f   : > { %1035 = vmatprep.subr.bf16.mxu0 %v1034_v40  ;;  %1057 = vmatpush3.bf16.msra.mxu1 %v1056_v2  ;;  %v1577_v28 = vld [vmem:[%s1535_s14 + $0x30] sm:$0xff]  ;;  %v1582_v29 = vld [vmem:[%s1535_s14 + $0x38] sm:$0xff]  ;;  %v1587_v30 = vld [vmem:[%s1535_s14 + $0x40] sm:$0xff] }
  0x80   : > { %1059 = vmatprep.subr.bf16.mxu1 %v1058_v5  ;;  %v1592_v31 = vld [vmem:[%s1535_s14 + $0x48] sm:$0xff]  ;;  %v1597_v32 = vld [vmem:[%s1535_s14 + $0x50] sm:$0xff]  ;;  %v1602_v33 = vld [vmem:[%s1535_s14 + $0x58] sm:$0xff] }
  0x81   : > { %v1607_v34 = vld [vmem:[%s1535_s14 + $0x60] sm:$0xff]  ;;  %v1612_v35 = vld [vmem:[%s1535_s14 + $0x68] sm:$0xff]  ;;  %v1617_v36 = vld [vmem:[%s1535_s14 + $0x70] sm:$0xff] }
  0x82   : > { %1037 = vmatpush1.bf16.msra.mxu0 %v1036_v51  ;;  %v1622_v37 = vld [vmem:[%s1535_s14 + $0x78] sm:$0xff]  ;;  %v587_v38 = vld [vmem:[#allocation7 + $0xe0] sm:$0xff]  ;;  %v588_v39 = vld [vmem:[#allocation7 + $0xe8] sm:$0xff] }
  0x83   : > { %1039 = vmatprep.subr.bf16.mxu0 %v1038_v55  ;;  %1061 = vmatpush3.bf16.msra.mxu1 %v1060_v11  ;;  %v1070_v40 = vpack.c.bf16 %v588_v39, %v587_v38  ;;  %v571_v41 = vld [vmem:[#allocation7 + $0x60] sm:$0xff]  ;;  %v572_v42 = vld [vmem:[#allocation7 + $0x68] sm:$0xff]  ;;  %v589_v44 = vld [vmem:[#allocation7 + $0xf0] sm:$0xff] }
  0x84   : > { %1063 = vmatprep.subr.bf16.mxu1 %v1062_v12  ;;  %v1072_v43 = vpack.c.bf16 %v572_v42, %v571_v41  ;;  %v590_v45 = vld [vmem:[#allocation7 + $0xf8] sm:$0xff]  ;;  %v573_v47 = vld [vmem:[#allocation7 + $0x70] sm:$0xff]  ;;  %v322_v52 = vld [vmem:[%s1774_s2] sm:$0x3] }
  0x85   : > { %v1074_v46 = vpack.c.bf16 %v590_v45, %v589_v44  ;;  %v574_v48 = vld [vmem:[#allocation7 + $0x78] sm:$0xff] }
  0x86   : > { %1041 = vmatpush1.bf16.msra.mxu0 %v1040_v63  ;;  %v1076_v49 = vpack.c.bf16 %v574_v48, %v573_v47 }
  0x87   : > { %1043 = vmatprep.subr.bf16.mxu0 %v1042_v3  ;;  %1065 = vmatpush3.bf16.msra.mxu1 %v1064_v18 }
  0x88   : > { %1067 = vmatprep.subr.bf16.mxu1 %v1066_v19 }
  0x8a   : > { %1045 = vmatpush1.bf16.msra.mxu0 %v1044_v10 }
  0x8b   : > { %1069 = vmatpush3.bf16.msra.mxu1 %v1068_v23 }
  0x8c   : > { %1071 = vmatprep.subr.bf16.mxu1 %v1070_v40 }
  0x8d   : > { %399 = vmatmul.mubr.f32.vlgmr.msra.gmra.mrb[0].mxu0 %v1547_v17 }
  0x8e   : > { %404 = vmatprep.mubr.f32.mxu0 %v1317_v0 }
  0x8f   : > { %1073 = vmatpush3.bf16.msra.mxu1 %v1072_v43 }
  0x90   : > { %1075 = vmatprep.subr.bf16.mxu1 %v1074_v46 }
  0x91   : > { %405 = vmatmul.mubr.f32.gmra.mrb[2].mxu0 %v1552_v22 }
  0x92   : > { %410 = vmatprep.mubr.f32.mxu0 %v1317_v0 }
  0x93   : > { %1077 = vmatpush3.bf16.msra.mxu1 %v1076_v49 }
  0x95   : > { %411 = vmatmul.mubr.f32.gmra.mrb[4].mxu0 %v1557_v24 }
  0x96   : > { %416 = vmatprep.mubr.f32.mxu0 %v1317_v0 }
  0x99   : > { %417 = vmatmul.mubr.f32.gmra.mrb[6].mxu0 %v1562_v25 }
  0x9a   : > { %422 = vmatprep.mubr.f32.mxu0 %v1317_v0 }
  0x9d   : > { %423 = vmatmul.mubr.f32.gmra.mrb[8].mxu0 %v1567_v26 }
  0x9e   : > { %428 = vmatprep.mubr.f32.mxu0 %v1317_v0 }
  0xa1   : > { %429 = vmatmul.mubr.f32.gmra.mrb[10].mxu0 %v1572_v27 }
  0xa2   : > { %434 = vmatprep.mubr.f32.mxu0 %v1317_v0 }
  0xa5   : > { %435 = vmatmul.mubr.f32.gmra.mrb[12].mxu0 %v1577_v28 }
  0xa6   : > { %440 = vmatprep.mubr.f32.mxu0 %v1317_v0 }
  0xa9   : > { %441 = vmatmul.mubr.f32.gmra.mrb[14].mxu0 %v1582_v29 }
  0xaa   : > { %446 = vmatprep.mubr.f32.mxu0 %v1317_v0 }
  0xad   : > { %447 = vmatmul.mubr.f32.gmra.mrb[16].mxu0 %v1587_v30 }
  0xae   : > { %452 = vmatprep.mubr.f32.mxu0 %v1317_v0 }
  0xb1   : > { %453 = vmatmul.mubr.f32.gmra.mrb[18].mxu0 %v1592_v31 }
  0xb2   : > { %458 = vmatprep.mubr.f32.mxu0 %v1317_v0 }
  0xb5   : > { %459 = vmatmul.mubr.f32.gmra.mrb[20].mxu0 %v1597_v32 }
  0xb6   : > { %464 = vmatprep.mubr.f32.mxu0 %v1317_v0 }
  0xb9   : > { %465 = vmatmul.mubr.f32.gmra.mrb[22].mxu0 %v1602_v33 }
  0xba   : > { %470 = vmatprep.mubr.f32.mxu0 %v1317_v0 }
  0xbd   : > { %471 = vmatmul.mubr.f32.gmra.mrb[24].mxu0 %v1607_v34 }
  0xbe   : > { %476 = vmatprep.mubr.f32.mxu0 %v1317_v0 }
  0xc1   : > { %477 = vmatmul.mubr.f32.gmra.mrb[26].mxu0 %v1612_v35 }
  0xc2   : > { %482 = vmatprep.mubr.f32.mxu0 %v1317_v0 }
  0xc5   : > { %483 = vmatmul.mubr.f32.gmra.mrb[28].mxu0 %v1617_v36 }
  0xc6   : > { %488 = vmatprep.mubr.f32.mxu0 %v1317_v0  ;;  %v324_v0 = vlaneseq }
  0xc8   : > { %v325_v50 = vshrl.u32 %v324_v0, 7 }
  0xc9   : > { %489 = vmatmul.mubr.f32.gmra.mrb[30].mxu0 %v1622_v37 }
  0xca   : > { %v326_v51 = vsub.s32 0, %v325_v50  ;;  %v330_v53 = vsub.s32 1, %v325_v50 }
  0xcc   : > { %v1628_v54 = vrot.slane %v322_v52, %v326_v51  ;;  %v1630_v55 = vrot.slane %v322_v52, %v330_v53 }
 0x160   : > { %v400_v56 = vpop.f32.mrb[0].mxu0 }
 0x161   : > { %v401_v57 = vadd.f32 %v400_v56, %v1628_v54  ;;  %v402_v58 = vpop.f32.mrb[1].mxu0 }
 0x162   : > { %v403_v59 = vadd.f32 %v402_v58, %v1630_v55 }
 0x163   : > { %v495_v60 = vmul.f32 0.01, %v401_v57 }
 0x164   : > { %v406_v61 = vpop.f32.mrb[2].mxu0  ;;  %v496_v62 = vmul.f32 0.01, %v403_v59 }
 0x165   : > { %v407_v63 = vadd.f32 %v406_v61, %v1628_v54  ;;  %v408_v1 = vpop.f32.mrb[3].mxu0  ;;  %v527_v4 = vmax.f32 %v401_v57, %v495_v60 }
 0x166   : > { %v409_v2 = vadd.f32 %v408_v1, %v1630_v55  ;;  %v528_v3 = vmax.f32 %v403_v59, %v496_v62 }
 0x167   : > { %v497_v5 = vmul.f32 0.01, %v407_v63 }
 0x168   : > { %v498_v6 = vmul.f32 0.01, %v409_v2  ;;  %v412_v7 = vpop.f32.mrb[4].mxu0  ;;  %662 = vmatprep.mubr.f32.mxu1 %v528_v3 }
 0x169   : > { %v413_v8 = vadd.f32 %v412_v7, %v1628_v54  ;;  %v414_v9 = vpop.f32.mrb[5].mxu0  ;;  %663 = vmatmul.mubr.f32.vlgmr.msra.gmra.mrb[0].mxu1 %v527_v4  ;;  %v529_v12 = vmax.f32 %v407_v63, %v497_v5 }
 0x16a   : > { %v530_v10 = vmax.f32 %v409_v2, %v498_v6  ;;  %v415_v11 = vadd.f32 %v414_v9, %v1630_v55 }
 0x16b   : > { %v499_v13 = vmul.f32 0.01, %v413_v8 }
 0x16c   : > { %v500_v14 = vmul.f32 0.01, %v415_v11  ;;  %v418_v15 = vpop.f32.mrb[6].mxu0  ;;  %667 = vmatprep.mubr.f32.mxu1 %v530_v10 }
 0x16d   : > { %v419_v16 = vadd.f32 %v418_v15, %v1628_v54  ;;  %v420_v18 = vpop.f32.mrb[7].mxu0  ;;  %668 = vmatmul.mubr.f32.gmra.mrb[2].mxu1 %v529_v12  ;;  %v531_v21 = vmax.f32 %v413_v8, %v499_v13 }
 0x16e   : > { %v532_v19 = vmax.f32 %v415_v11, %v500_v14  ;;  %v421_v20 = vadd.f32 %v420_v18, %v1630_v55 }
 0x16f   : > { %v501_v23 = vmul.f32 0.01, %v419_v16 }
 0x170   : > { %v502_v38 = vmul.f32 0.01, %v421_v20  ;;  %v424_v39 = vpop.f32.mrb[8].mxu0  ;;  %672 = vmatprep.mubr.f32.mxu1 %v532_v19 }
 0x171   : > { %v425_v40 = vadd.f32 %v424_v39, %v1628_v54  ;;  %v426_v41 = vpop.f32.mrb[9].mxu0  ;;  %673 = vmatmul.mubr.f32.gmra.mrb[4].mxu1 %v531_v21  ;;  %v533_v44 = vmax.f32 %v419_v16, %v501_v23 }
 0x172   : > { %v534_v42 = vmax.f32 %v421_v20, %v502_v38  ;;  %v427_v43 = vadd.f32 %v426_v41, %v1630_v55 }
 0x173   : > { %v503_v45 = vmul.f32 0.01, %v425_v40 }
 0x174   : > { %v504_v46 = vmul.f32 0.01, %v427_v43  ;;  %v430_v47 = vpop.f32.mrb[10].mxu0  ;;  %677 = vmatprep.mubr.f32.mxu1 %v534_v42 }
 0x175   : > { %v431_v48 = vadd.f32 %v430_v47, %v1628_v54  ;;  %v432_v49 = vpop.f32.mrb[11].mxu0  ;;  %678 = vmatmul.mubr.f32.gmra.mrb[6].mxu1 %v533_v44  ;;  %v535_v51 = vmax.f32 %v425_v40, %v503_v45 }
 0x176   : > { %v536_v0 = vmax.f32 %v427_v43, %v504_v46  ;;  %v433_v50 = vadd.f32 %v432_v49, %v1630_v55 }
 0x177   : > { %v505_v52 = vmul.f32 0.01, %v431_v48 }
 0x178   : > { %v506_v53 = vmul.f32 0.01, %v433_v50  ;;  %v436_v56 = vpop.f32.mrb[12].mxu0  ;;  %682 = vmatprep.mubr.f32.mxu1 %v536_v0 }
 0x179   : > { %v437_v57 = vadd.f32 %v436_v56, %v1628_v54  ;;  %v438_v58 = vpop.f32.mrb[13].mxu0  ;;  %683 = vmatmul.mubr.f32.gmra.mrb[8].mxu1 %v535_v51  ;;  %v537_v61 = vmax.f32 %v431_v48, %v505_v52 }
 0x17a   : > { %v538_v59 = vmax.f32 %v433_v50, %v506_v53  ;;  %v439_v60 = vadd.f32 %v438_v58, %v1630_v55 }
 0x17b   : > { %v507_v62 = vmul.f32 0.01, %v437_v57 }
 0x17c   : > { %v508_v63 = vmul.f32 0.01, %v439_v60  ;;  %v442_v1 = vpop.f32.mrb[14].mxu0  ;;  %687 = vmatprep.mubr.f32.mxu1 %v538_v59 }
 0x17d   : > { %v443_v2 = vadd.f32 %v442_v1, %v1628_v54  ;;  %v444_v3 = vpop.f32.mrb[15].mxu0  ;;  %688 = vmatmul.mubr.f32.gmra.mrb[10].mxu1 %v537_v61  ;;  %v539_v6 = vmax.f32 %v437_v57, %v507_v62 }
 0x17e   : > { %v540_v4 = vmax.f32 %v439_v60, %v508_v63  ;;  %v445_v5 = vadd.f32 %v444_v3, %v1630_v55 }
 0x17f   : > { %v509_v7 = vmul.f32 0.01, %v443_v2 }
 0x180   : > { %v510_v8 = vmul.f32 0.01, %v445_v5  ;;  %v448_v9 = vpop.f32.mrb[16].mxu0  ;;  %692 = vmatprep.mubr.f32.mxu1 %v540_v4 }
 0x181   : > { %v449_v10 = vadd.f32 %v448_v9, %v1628_v54  ;;  %v450_v11 = vpop.f32.mrb[17].mxu0  ;;  %693 = vmatmul.mubr.f32.gmra.mrb[12].mxu1 %v539_v6  ;;  %v541_v14 = vmax.f32 %v443_v2, %v509_v7 }
 0x182   : > { %v542_v12 = vmax.f32 %v445_v5, %v510_v8  ;;  %v451_v13 = vadd.f32 %v450_v11, %v1630_v55 }
 0x183   : > { %v511_v15 = vmul.f32 0.01, %v449_v10 }
 0x184   : > { %v512_v16 = vmul.f32 0.01, %v451_v13  ;;  %v454_v18 = vpop.f32.mrb[18].mxu0  ;;  %697 = vmatprep.mubr.f32.mxu1 %v542_v12 }
 0x185   : > { %v455_v19 = vadd.f32 %v454_v18, %v1628_v54  ;;  %v456_v20 = vpop.f32.mrb[19].mxu0  ;;  %698 = vmatmul.mubr.f32.gmra.mrb[14].mxu1 %v541_v14  ;;  %v543_v38 = vmax.f32 %v449_v10, %v511_v15 }
 0x186   : > { %v544_v21 = vmax.f32 %v451_v13, %v512_v16  ;;  %v457_v23 = vadd.f32 %v456_v20, %v1630_v55 }
 0x187   : > { %v513_v39 = vmul.f32 0.01, %v455_v19 }
 0x188   : > { %v514_v40 = vmul.f32 0.01, %v457_v23  ;;  %v460_v41 = vpop.f32.mrb[20].mxu0  ;;  %702 = vmatprep.mubr.f32.mxu1 %v544_v21 }
 0x189   : > { %v461_v42 = vadd.f32 %v460_v41, %v1628_v54  ;;  %v462_v43 = vpop.f32.mrb[21].mxu0  ;;  %703 = vmatmul.mubr.f32.gmra.mrb[16].mxu1 %v543_v38  ;;  %v545_v46 = vmax.f32 %v455_v19, %v513_v39 }
 0x18a   : > { %v546_v44 = vmax.f32 %v457_v23, %v514_v40  ;;  %v463_v45 = vadd.f32 %v462_v43, %v1630_v55 }
 0x18b   : > { %v515_v47 = vmul.f32 0.01, %v461_v42 }
 0x18c   : > { %v516_v48 = vmul.f32 0.01, %v463_v45  ;;  %v466_v49 = vpop.f32.mrb[22].mxu0  ;;  %707 = vmatprep.mubr.f32.mxu1 %v546_v44 }
 0x18d   : > { %v467_v0 = vadd.f32 %v466_v49, %v1628_v54  ;;  %v468_v50 = vpop.f32.mrb[23].mxu0  ;;  %708 = vmatmul.mubr.f32.gmra.mrb[18].mxu1 %v545_v46  ;;  %v547_v53 = vmax.f32 %v461_v42, %v515_v47 }
 0x18e   : > { %v548_v51 = vmax.f32 %v463_v45, %v516_v48  ;;  %v469_v52 = vadd.f32 %v468_v50, %v1630_v55 }
 0x18f   : > { %v517_v56 = vmul.f32 0.01, %v467_v0 }
 0x190   : > { %v518_v57 = vmul.f32 0.01, %v469_v52  ;;  %v472_v58 = vpop.f32.mrb[24].mxu0  ;;  %712 = vmatprep.mubr.f32.mxu1 %v548_v51 }
 0x191   : > { %v473_v59 = vadd.f32 %v472_v58, %v1628_v54  ;;  %v474_v60 = vpop.f32.mrb[25].mxu0  ;;  %713 = vmatmul.mubr.f32.gmra.mrb[20].mxu1 %v547_v53  ;;  %v549_v63 = vmax.f32 %v467_v0, %v517_v56 }
 0x192   : > { %v550_v61 = vmax.f32 %v469_v52, %v518_v57  ;;  %v475_v62 = vadd.f32 %v474_v60, %v1630_v55 }
 0x193   : > { %v519_v1 = vmul.f32 0.01, %v473_v59 }
 0x194   : > { %v520_v2 = vmul.f32 0.01, %v475_v62  ;;  %v478_v3 = vpop.f32.mrb[26].mxu0  ;;  %717 = vmatprep.mubr.f32.mxu1 %v550_v61 }
 0x195   : > { %v479_v4 = vadd.f32 %v478_v3, %v1628_v54  ;;  %v480_v5 = vpop.f32.mrb[27].mxu0  ;;  %718 = vmatmul.mubr.f32.gmra.mrb[22].mxu1 %v549_v63  ;;  %v551_v8 = vmax.f32 %v473_v59, %v519_v1 }
 0x196   : > { %v552_v6 = vmax.f32 %v475_v62, %v520_v2  ;;  %v481_v7 = vadd.f32 %v480_v5, %v1630_v55 }
 0x197   : > { %v521_v9 = vmul.f32 0.01, %v479_v4 }
 0x198   : > { %v522_v10 = vmul.f32 0.01, %v481_v7  ;;  %v484_v11 = vpop.f32.mrb[28].mxu0  ;;  %722 = vmatprep.mubr.f32.mxu1 %v552_v6 }
 0x199   : > { %v485_v12 = vadd.f32 %v484_v11, %v1628_v54  ;;  %v486_v13 = vpop.f32.mrb[29].mxu0  ;;  %723 = vmatmul.mubr.f32.gmra.mrb[24].mxu1 %v551_v8  ;;  %v553_v16 = vmax.f32 %v479_v4, %v521_v9 }
 0x19a   : > { %v554_v14 = vmax.f32 %v481_v7, %v522_v10  ;;  %v487_v15 = vadd.f32 %v486_v13, %v1630_v55 }
 0x19b   : > { %v523_v18 = vmul.f32 0.01, %v485_v12 }
 0x19c   : > { %v524_v19 = vmul.f32 0.01, %v487_v15  ;;  %v490_v20 = vpop.f32.mrb[30].mxu0  ;;  %727 = vmatprep.mubr.f32.mxu1 %v554_v14 }
 0x19d   : > { %v491_v21 = vadd.f32 %v490_v20, %v1628_v54  ;;  %v492_v23 = vpop.f32.mrb[31].mxu0  ;;  %728 = vmatmul.mubr.f32.gmra.mrb[26].mxu1 %v553_v16  ;;  %v555_v40 = vmax.f32 %v485_v12, %v523_v18  ;;  %v1667_v54 = vld [vmem:[%s1776_s4] ss:$0 sm:$0xff] }
 0x19e   : > { %v556_v38 = vmax.f32 %v487_v15, %v524_v19  ;;  %v493_v39 = vadd.f32 %v492_v23, %v1630_v55 }
 0x19f   : > { %v525_v41 = vmul.f32 0.01, %v491_v21 }
 0x1a0   : > { %v526_v42 = vmul.f32 0.01, %v493_v39  ;;  %732 = vmatprep.mubr.f32.mxu1 %v556_v38 }
 0x1a1   : > { %733 = vmatmul.mubr.f32.gmra.mrb[28].mxu1 %v555_v40  ;;  %v557_v44 = vmax.f32 %v491_v21, %v525_v41 }
 0x1a2   : > { %v558_v43 = vmax.f32 %v493_v39, %v526_v42 }
 0x1a4   : > { %737 = vmatprep.mubr.f32.mxu1 %v558_v43 }
 0x1a5   : > { %738 = vmatmul.mubr.f32.gmra.mrb[30].mxu1 %v557_v44 }
 0x23c   : > { %v966_v45 = vpop.f32.mrb[0].mxu1 }
 0x23d   : > { %v967_v46 = vpop.f32.mrb[1].mxu1 }
 0x23e   : > { %v968_v47 = vadd.f32 %v967_v46, %v966_v45 }
 0x240   : > { %v665_v55 = vadd.f32 %v968_v47, %v1667_v54  ;;  %v969_v48 = vpop.f32.mrb[2].mxu1 }
 0x241   : > { %v970_v49 = vpop.f32.mrb[3].mxu1 }
 0x242   : > { %v743_v0 = vmul.f32 0.01, %v665_v55  ;;  %v971_v50 = vadd.f32 %v970_v49, %v969_v48 }
 0x244   : > { %v759_v51 = vmax.f32 %v665_v55, %v743_v0  ;;  %v670_v52 = vadd.f32 %v971_v50, %v1667_v54  ;;  %v972_v53 = vpop.f32.mrb[4].mxu1 }
 0x245   : > { %v973_v56 = vpop.f32.mrb[5].mxu1 }
 0x246   : > { %v775_v57 = vadd.f32 %v759_v51, %v1547_v17  ;;  %v744_v58 = vmul.f32 0.01, %v670_v52  ;;  %v974_v59 = vadd.f32 %v973_v56, %v972_v53 }
 0x248   : > { %791 = vst [vmem:[%s1674_s10] sm:$0xff] %v775_v57  ;;  %v760_v60 = vmax.f32 %v670_v52, %v744_v58  ;;  %v675_v61 = vadd.f32 %v974_v59, %v1667_v54  ;;  %v975_v62 = vpop.f32.mrb[6].mxu1 }
 0x249   : > { %v976_v63 = vpop.f32.mrb[7].mxu1 }
 0x24a   : > { %v776_v1 = vadd.f32 %v760_v60, %v1552_v22  ;;  %v745_v2 = vmul.f32 0.01, %v675_v61  ;;  %v977_v3 = vadd.f32 %v976_v63, %v975_v62 }
 0x24c   : > { %792 = vst [vmem:[%s1674_s10 + $0x8] sm:$0xff] %v776_v1  ;;  %v761_v17 = vmax.f32 %v675_v61, %v745_v2  ;;  %v680_v4 = vadd.f32 %v977_v3, %v1667_v54  ;;  %v978_v5 = vpop.f32.mrb[8].mxu1 }
 0x24d   : > { %v979_v6 = vpop.f32.mrb[9].mxu1 }
 0x24e   : > { %v777_v7 = vadd.f32 %v761_v17, %v1557_v24  ;;  %v746_v8 = vmul.f32 0.01, %v680_v4  ;;  %v980_v9 = vadd.f32 %v979_v6, %v978_v5 }
 0x250   : > { %793 = vst [vmem:[%s1674_s10 + $0x10] sm:$0xff] %v777_v7  ;;  %v762_v10 = vmax.f32 %v680_v4, %v746_v8  ;;  %v685_v11 = vadd.f32 %v980_v9, %v1667_v54  ;;  %v981_v12 = vpop.f32.mrb[10].mxu1 }
 0x251   : > { %v982_v22 = vpop.f32.mrb[11].mxu1 }
 0x252   : > { %v778_v13 = vadd.f32 %v762_v10, %v1562_v25  ;;  %v747_v14 = vmul.f32 0.01, %v685_v11  ;;  %v983_v15 = vadd.f32 %v982_v22, %v981_v12 }
 0x254   : > { %794 = vst [vmem:[%s1674_s10 + $0x18] sm:$0xff] %v778_v13  ;;  %v763_v16 = vmax.f32 %v685_v11, %v747_v14  ;;  %v690_v18 = vadd.f32 %v983_v15, %v1667_v54  ;;  %v984_v19 = vpop.f32.mrb[12].mxu1 }
 0x255   : > { %v985_v24 = vpop.f32.mrb[13].mxu1 }
 0x256   : > { %v779_v20 = vadd.f32 %v763_v16, %v1567_v26  ;;  %v748_v21 = vmul.f32 0.01, %v690_v18  ;;  %v986_v23 = vadd.f32 %v985_v24, %v984_v19 }
 0x258   : > { %795 = vst [vmem:[%s1674_s10 + $0x20] sm:$0xff] %v779_v20  ;;  %v764_v38 = vmax.f32 %v690_v18, %v748_v21  ;;  %v695_v39 = vadd.f32 %v986_v23, %v1667_v54  ;;  %v987_v40 = vpop.f32.mrb[14].mxu1 }
 0x259   : > { %v988_v25 = vpop.f32.mrb[15].mxu1 }
 0x25a   : > { %v780_v41 = vadd.f32 %v764_v38, %v1572_v27  ;;  %v749_v42 = vmul.f32 0.01, %v695_v39  ;;  %v989_v43 = vadd.f32 %v988_v25, %v987_v40 }
 0x25c   : > { %796 = vst [vmem:[%s1674_s10 + $0x28] sm:$0xff] %v780_v41  ;;  %v765_v44 = vmax.f32 %v695_v39, %v749_v42  ;;  %v700_v45 = vadd.f32 %v989_v43, %v1667_v54  ;;  %v990_v46 = vpop.f32.mrb[16].mxu1 }
 0x25d   : > { %v991_v26 = vpop.f32.mrb[17].mxu1 }
 0x25e   : > { %v781_v47 = vadd.f32 %v765_v44, %v1577_v28  ;;  %v750_v55 = vmul.f32 0.01, %v700_v45  ;;  %v992_v48 = vadd.f32 %v991_v26, %v990_v46 }
 0x260   : > { %797 = vst [vmem:[%s1674_s10 + $0x30] sm:$0xff] %v781_v47  ;;  %v766_v49 = vmax.f32 %v700_v45, %v750_v55  ;;  %v705_v0 = vadd.f32 %v992_v48, %v1667_v54  ;;  %v993_v50 = vpop.f32.mrb[18].mxu1 }
 0x261   : > { %v994_v27 = vpop.f32.mrb[19].mxu1 }
 0x262   : > { %v782_v51 = vadd.f32 %v766_v49, %v1582_v29  ;;  %v751_v52 = vmul.f32 0.01, %v705_v0  ;;  %v995_v53 = vadd.f32 %v994_v27, %v993_v50 }
 0x264   : > { %798 = vst [vmem:[%s1674_s10 + $0x38] sm:$0xff] %v782_v51  ;;  %v767_v56 = vmax.f32 %v705_v0, %v751_v52  ;;  %v710_v57 = vadd.f32 %v995_v53, %v1667_v54  ;;  %v996_v58 = vpop.f32.mrb[20].mxu1 }
 0x265   : > { %v997_v28 = vpop.f32.mrb[21].mxu1 }
 0x266   : > { %v783_v59 = vadd.f32 %v767_v56, %v1587_v30  ;;  %v752_v60 = vmul.f32 0.01, %v710_v57  ;;  %v998_v61 = vadd.f32 %v997_v28, %v996_v58 }
 0x268   : > { %799 = vst [vmem:[%s1674_s10 + $0x40] sm:$0xff] %v783_v59  ;;  %v768_v62 = vmax.f32 %v710_v57, %v752_v60  ;;  %v715_v63 = vadd.f32 %v998_v61, %v1667_v54  ;;  %v999_v1 = vpop.f32.mrb[22].mxu1 }
 0x269   : > { %v1000_v29 = vpop.f32.mrb[23].mxu1 }
 0x26a   : > { %v784_v2 = vadd.f32 %v768_v62, %v1592_v31  ;;  %v753_v3 = vmul.f32 0.01, %v715_v63  ;;  %v1001_v17 = vadd.f32 %v1000_v29, %v999_v1 }
 0x26c   : > { %800 = vst [vmem:[%s1674_s10 + $0x48] sm:$0xff] %v784_v2  ;;  %v769_v4 = vmax.f32 %v715_v63, %v753_v3  ;;  %v720_v5 = vadd.f32 %v1001_v17, %v1667_v54  ;;  %v1002_v6 = vpop.f32.mrb[24].mxu1 }
 0x26d   : > { %v1003_v30 = vpop.f32.mrb[25].mxu1 }
 0x26e   : > { %v785_v7 = vadd.f32 %v769_v4, %v1597_v32  ;;  %v754_v8 = vmul.f32 0.01, %v720_v5  ;;  %v1004_v9 = vadd.f32 %v1003_v30, %v1002_v6 }
 0x270   : > { %801 = vst [vmem:[%s1674_s10 + $0x50] sm:$0xff] %v785_v7  ;;  %v770_v10 = vmax.f32 %v720_v5, %v754_v8  ;;  %v725_v11 = vadd.f32 %v1004_v9, %v1667_v54  ;;  %v1005_v12 = vpop.f32.mrb[26].mxu1 }
 0x271   : > { %v1006_v31 = vpop.f32.mrb[27].mxu1 }
 0x272   : > { %v786_v22 = vadd.f32 %v770_v10, %v1602_v33  ;;  %v755_v13 = vmul.f32 0.01, %v725_v11  ;;  %v1007_v14 = vadd.f32 %v1006_v31, %v1005_v12 }
 0x274   : > { %802 = vst [vmem:[%s1674_s10 + $0x58] sm:$0xff] %v786_v22  ;;  %v771_v15 = vmax.f32 %v725_v11, %v755_v13  ;;  %v730_v16 = vadd.f32 %v1007_v14, %v1667_v54  ;;  %v1008_v18 = vpop.f32.mrb[28].mxu1 }
 0x275   : > { %v1009_v32 = vpop.f32.mrb[29].mxu1 }
 0x276   : > { %v787_v19 = vadd.f32 %v771_v15, %v1607_v34  ;;  %v756_v24 = vmul.f32 0.01, %v730_v16  ;;  %v1010_v20 = vadd.f32 %v1009_v32, %v1008_v18 }
 0x278   : > { %803 = vst [vmem:[%s1674_s10 + $0x60] sm:$0xff] %v787_v19  ;;  %v772_v21 = vmax.f32 %v730_v16, %v756_v24  ;;  %v735_v33 = vadd.f32 %v1010_v20, %v1667_v54  ;;  %v1011_v23 = vpop.f32.mrb[30].mxu1 }
 0x279   : > { %v1012_v38 = vpop.f32.mrb[31].mxu1 }
 0x27a   : > { %v788_v39 = vadd.f32 %v772_v21, %v1612_v35  ;;  %v757_v40 = vmul.f32 0.01, %v735_v33  ;;  %v1013_v25 = vadd.f32 %v1012_v38, %v1011_v23 }
 0x27c   : > { %804 = vst [vmem:[%s1674_s10 + $0x68] sm:$0xff] %v788_v39  ;;  %v773_v34 = vmax.f32 %v735_v33, %v757_v40  ;;  %v740_v41 = vadd.f32 %v1013_v25, %v1667_v54 }
 0x27e   : > { %v789_v42 = vadd.f32 %v773_v34, %v1617_v36  ;;  %v758_v43 = vmul.f32 0.01, %v740_v41 }
 0x280   : > { %805 = vst [vmem:[%s1674_s10 + $0x70] sm:$0xff] %v789_v42  ;;  %v774_v44 = vmax.f32 %v740_v41, %v758_v43 }
 0x282   : > { %v790_v35 = vadd.f32 %v774_v44, %v1622_v37 }
 0x284   : > { %806 = vst [vmem:[%s1674_s10 + $0x78] sm:$0xff] %v790_v35 }
 0x285   : > { %1251 = shalt.err (!%p1248_p2)
}
 0x286   : > { %s1252_s14 = scalar_lea.hbm %s1724_s11, 2048  ;;  %s1256_s12 = scalar_lea.hbm %s1777_s5, 4096 }
 0x287   : > { %p1253_p13 = scmp.ne.s32.totalorder %s1724_s11, %s1252_s14  ;;  %p1257_p4 = scmp.lt.u32.totalorder %s1724_s11, %s1777_s5 }
 0x288   : > { %p1258_p7 = scmp.lt.u32.totalorder %s1256_s12, %s1252_s14  ;;  %p1260_p11 = scmp.lt.u32.totalorder %s1252_s14, %s1724_s11 }
 0x289   : > { %p1254_p6 = pnand %p1253_p13, %p1791_p0 }
 0x28a   : > { %p1259_p8 = por %p1258_p7, %p1257_p4 }
 0x28b   : > { %p1255_p10 = pneg %p1254_p6 }
 0x28c   : > { %p1261_p1 = por %p1260_p11, %p1259_p8 }
 0x28e   : > { %p1262_p3 = pnand %p1261_p1, %p1255_p10 }
 0x290   : > { %1265 = shalt.err (!%p1262_p3)
}
 0x291   : > { %s1319_s28 = smov 128   ;;  %s1320_s9 = smov 8  }
 0x292   : > { %1088 = dma.vmem_to_hbm [thread:$0]  (%p1791_p0), %s1726_s15, 2048, %s1724_s11, %s808_s23, %s1319_s28, %s1319_s28, %s1320_s9  }
 0x293 PF: > { %s836_s30 = sand.u32 1, %s1296_s18   ;;  %p1792_p5 = scmp.ne.s32.totalorder %s1782_s25, 0 }
 0x294   : > { %p1793_p9 = scmp.ge.s32.totalorder %s1308_s21, 2  ;;  %s837_s7 = scalar_lea.sflag [#allocation4], %s836_s30 }
 0x296   : > { %p1102_p12 = pnand %p1793_p9, %p1792_p5 }
 0x298   : > { %1291 = dma.done.wait (!%p1102_p12), %s837_s7, 2048  }
 0x299   : > { %1293 = vsyncadd (!%p1102_p12), %s837_s7, 4294965248  ;;  %p19_p2 = scmp.ge.s32.totalorder %s1464_s16, 4   ;;  %s1794_s18 = smov %s1300_s19 }
 0x29a   : > { %s1795_s19 = smov %s1304_s20  ;;  %s1796_s20 = smov %s1473_s27 }
 0x29b   : > { %s1797_s21 = smov %s1464_s16  ;;  %21 = sbr.rel (!%p19_p2) target bundleno = 6 (0x6), region = 93 }
 0x2a2   :  { %842 = vsyncpa [#allocation3], 1 }
 0x2a3   :  { %844 = vsyncpa [#allocation3 + $0x1], 1 }
 0x2a4   :  { %845 = vsyncpa [#allocation6], 1 }
 0x2a5   :  { %846 = vsyncpa [#allocation4], 1 }
 0x2a6   :  { %848 = vsyncpa [#allocation4 + $0x1], 1 }

</bundles_post_ra>
